<compile_context>
chip_gen: v7x
topology: tpu7x:2x2x1
jax: 0.10.0
libtpu: 0.0.40
codegen_flags: <defaults>
</compile_context>

<pallas_src>
import functools

import jax
import jax.numpy as jnp
from jax.experimental import pallas as pl
from jax.experimental.pallas import tpu as pltpu


def _round_up(x, m):
    return (x + m - 1) // m * m


def _sublane(dtype):
    # sublane packing for the (tb, D) output block: 8 f32, 16 bf16, 32 int8/fp8
    return max(8, 32 // jnp.dtype(dtype).itemsize)


def _make_kernel(s_valid, ts, needs_mask):
    def kernel(x_ref, w_ref, b_ref, o_ref, m_sc, l_sc, acc_sc):
        # x_ref: (tb, ts, d) VMEM   input block
        # w_ref: (1, d)      VMEM   linear weight row (resident)
        # b_ref: (1, 1)      SMEM   linear bias (scalar)
        # o_ref: (tb, d)     VMEM   lane-dense output block (written at last seq step)
        # m/l/acc: online-softmax running max / denom / weighted sum
        s_idx = pl.program_id(1)

        @pl.when(s_idx == 0)
        def _():
            m_sc[...] = jnp.full_like(m_sc, -jnp.inf)
            l_sc[...] = jnp.zeros_like(l_sc)
            acc_sc[...] = jnp.zeros_like(acc_sc)

        x = x_ref[...].astype(jnp.float32)          # no-op for f32 inputs
        w = w_ref[...].astype(jnp.float32)          # (1, d)
        bias = b_ref[0, 0]

        # scores = tanh(<x, w> + b): VPU multiply + lane reduce (no MXU).
        scores = jnp.tanh(jnp.sum(x * w, axis=-1) + bias)          # (tb, ts)
        if needs_mask:
            pos = s_idx * ts + jax.lax.broadcasted_iota(jnp.int32, scores.shape, 1)
            scores = jnp.where(pos < s_valid, scores, jnp.float32(-1e30))

        # online softmax over the seq axis.
        m_prev = m_sc[...]                                          # (tb, 1)
        m_new = jnp.maximum(m_prev, jnp.max(scores, axis=-1, keepdims=True))
        alpha = jnp.exp(m_prev - m_new)                             # (tb, 1)
        p = jnp.exp(scores - m_new)                                 # (tb, ts)

        l_sc[...] = alpha * l_sc[...] + jnp.sum(p, axis=-1, keepdims=True)
        acc_sc[...] = alpha * acc_sc[...] + jnp.sum(x * p[:, :, None], axis=1)
        m_sc[...] = m_new

        @pl.when(s_idx == pl.num_programs(1) - 1)
        def _():
            # exact divide: fully hidden under the HBM stream.
            o_ref[...] = (acc_sc[...] / l_sc[...]).astype(o_ref.dtype)

    return kernel


def _pick_tiles(b_pad, s, d_pad, elt, sub, target_bytes):
    """Pick (tb, ts, s_pad): ~target_bytes per input block, no grid remainders."""
    row_bytes = s * d_pad * elt                       # one batch row, full seq
    if sub * row_bytes <= target_bytes:
        # full-seq path: seq fits; tile the batch axis only.
        ts, s_pad = s, s
        tb = max(sub, (target_bytes // row_bytes) // sub * sub)
        tb = min(tb, b_pad)
        # guarantee >=2 batch grid steps when possible (v7x: 2 TensorCores).
        if b_pad >= 2 * sub:
            tb = min(tb, max(sub, (b_pad // 2) // sub * sub))
        while tb > sub and b_pad % tb != 0:           # tb must divide b_pad
            tb -= sub
    else:
        # long-seq path: minimal batch tile, tile the seq axis instead.
        tb = sub
        ts = max(8, (target_bytes // (tb * d_pad * elt)) // 8 * 8)
        ts = min(ts, _round_up(s, 8))
        s_pad = _round_up(s, ts)
    return tb, ts, s_pad


@functools.partial(jax.jit, static_argnames=())
def _identity(x):  # tiny helper so padding stays on-device under jit callers
    return x


def attention_layer(features, w_row, bias):
    """features: (B, S, D); w_row: (1, D); bias: (1, 1) -> (B, D)."""
    B, S, D = features.shape
    elt = jnp.dtype(features.dtype).itemsize
    sub = _sublane(features.dtype)

    # Re-derive tiling from this generation's VMEM (v7x: 64 MiB vs 128 MiB).
    try:
        vmem_cap = pltpu.get_tpu_info().vmem_capacity_bytes
    except Exception:
        vmem_cap = 64 << 20                      # most constrained generation (v7x)
    target_block = max(1 << 20, vmem_cap // 8)   # 8 MiB v7x, 16 MiB v5e/v6e

    d_pad = _round_up(D, 128)                    # lane-dense reduce + output
    b_pad = _round_up(B, sub)                    # sublane-dense output block
    tb, ts, s_pad = _pick_tiles(b_pad, S, d_pad, elt, sub, target_block)
    needs_mask = s_pad != S

    if (b_pad, s_pad, d_pad) != (B, S, D):
        features = jnp.pad(
            features, ((0, b_pad - B), (0, s_pad - S), (0, d_pad - D)))
    if d_pad != D:
        w_row = jnp.pad(w_row, ((0, 0), (0, d_pad - D)))

    # double-buffered input + ~1 block of in-kernel f32 temporaries
    # + output/accumulator blocks + resident weight + headroom.
    block_bytes = tb * ts * d_pad * elt
    needed = 3 * block_bytes + 4 * tb * d_pad * 4 + d_pad * elt + (2 << 20)
    vmem_limit = int(min(max(needed, 32 << 20), vmem_cap // 2))

    grid = (b_pad // tb, s_pad // ts)
    kernel = _make_kernel(S, ts, needs_mask)

    out = pl.pallas_call(
        kernel,
        out_shape=jax.ShapeDtypeStruct((b_pad, d_pad), features.dtype),
        grid=grid,
        in_specs=[
            pl.BlockSpec((tb, ts, d_pad), lambda b, s: (b, s, 0)),
            pl.BlockSpec((1, d_pad), lambda b, s: (0, 0)),       # resident weight
            pl.BlockSpec(memory_space=pltpu.MemorySpace.SMEM),   # scalar bias
        ],
        out_specs=pl.BlockSpec((tb, d_pad), lambda b, s: (b, 0)),
        scratch_shapes=[
            pltpu.VMEM((tb, 1), jnp.float32),       # running max
            pltpu.VMEM((tb, 1), jnp.float32),       # running denom
            pltpu.VMEM((tb, d_pad), jnp.float32),   # running weighted sum
        ],
        compiler_params=pltpu.CompilerParams(
            dimension_semantics=("parallel", "arbitrary"),
            vmem_limit_bytes=vmem_limit,
        ),
    )(features, w_row, bias)

    if (b_pad, d_pad) != (B, D):
        out = out[:B, :D]
    return out


def attention_layer_ref(features, w_row, bias):
    # pure-JAX reference mirroring the PyTorch forward exactly
    scores = jnp.tanh(jnp.einsum("bsd,od->bso", features, w_row) + bias[0, 0])
    attn = jax.nn.softmax(scores, axis=1)
    return jnp.sum(features * attn, axis=1)


if __name__ == "__main__":
    # Small shapes consistent with the module: (batch, seq, input_size=1280).
    B, S, D = 4, 8, 1280

    key = jax.random.PRNGKey(0)
    k_x, k_w, k_b = jax.random.split(key, 3)

    features = jax.random.normal(k_x, (B, S, D), dtype=jnp.float32)
    # nn.Linear(input_size, 1): weight (1, D), bias (1,), init U(-1/sqrt(D), 1/sqrt(D)).
    bound = 1.0 / jnp.sqrt(jnp.float32(D))
    w_lin = jax.random.uniform(k_w, (1, D), minval=-bound, maxval=bound,
                               dtype=jnp.float32)
    b_lin = jax.random.uniform(k_b, (1,), minval=-bound, maxval=bound,
                               dtype=jnp.float32)
    b_2d = b_lin.reshape(1, 1)

    out = attention_layer(features, w_lin, b_2d)
    out = jax.block_until_ready(out)

    ref = attention_layer_ref(features, w_lin, b_2d)
    assert out.shape == (B, D)
    assert jnp.allclose(out, ref, atol=1e-4, rtol=1e-4), "mismatch vs reference"

    print("KERNEL_OK")
</pallas_src>

<mosaic_0001>
module attributes {stable_mosaic.version = 11 : i64} {
  func.func @kernel(%arg0: i32, %arg1: i32, %arg2: memref<8x8x1280xf32, #tpu.memory_space<vmem>>, %arg3: memref<1x1280xf32, #tpu.memory_space<vmem>>, %arg4: memref<1x1xf32, #tpu.memory_space<smem>>, %arg5: memref<8x1280xf32, #tpu.memory_space<vmem>>, %arg6: memref<8x1xf32, #tpu.memory_space<vmem>>, %arg7: memref<8x1xf32, #tpu.memory_space<vmem>>, %arg8: memref<8x1280xf32, #tpu.memory_space<vmem>>) attributes {dimension_semantics = [#tpu.dimension_semantics<parallel>, #tpu.dimension_semantics<arbitrary>], iteration_bounds = array<i64: 1, 1>, scalar_prefetch = 0 : i64, scratch_operands = 3 : i64, tpu.core_type = #tpu.core_type<tc>, window_params = [{transform_indices = @transform_0, window_bounds = array<i64: 8, 8, 1280>}, {pipeline_mode = #tpu.pipeline_mode<synchronous>, transform_indices = @transform_1, window_bounds = array<i64: 1, 1280>}, {transform_indices = @transform_2, window_bounds = array<i64: 1, 1>}, {transform_indices = @transform_3, window_bounds = array<i64: 8, 1280>}]} {
    %c0_i32 = arith.constant 0 : i32
    %0 = arith.cmpi eq, %arg1, %c0_i32 : i32
    %1 = arith.extui %0 : i1 to i32
    %c0_i32_0 = arith.constant 0 : i32
    %2 = arith.cmpi ne, %1, %c0_i32_0 : i32
    scf.if %2 {
      %cst_24 = arith.constant 0xFF800000 : f32
      %41 = vector.broadcast %cst_24 : f32 to vector<8x1xf32>
      %c0_25 = arith.constant 0 : index
      %c0_26 = arith.constant 0 : index
      %42 = vector.load %arg6[%c0_25, %c0_26] : memref<8x1xf32, #tpu.memory_space<vmem>>, vector<8x1xf32>
      tpu.vector_store %arg6[%c0_25, %c0_26], %41 {strides = array<i32>} : memref<8x1xf32, #tpu.memory_space<vmem>>, vector<8x1xf32>,
      %cst_27 = arith.constant 0.000000e+00 : f32
      %43 = vector.broadcast %cst_27 : f32 to vector<8x1xf32>
      %c0_28 = arith.constant 0 : index
      %c0_29 = arith.constant 0 : index
      %44 = vector.load %arg7[%c0_28, %c0_29] : memref<8x1xf32, #tpu.memory_space<vmem>>, vector<8x1xf32>
      tpu.vector_store %arg7[%c0_28, %c0_29], %43 {strides = array<i32>} : memref<8x1xf32, #tpu.memory_space<vmem>>, vector<8x1xf32>,
      %cst_30 = arith.constant 0.000000e+00 : f32
      %45 = vector.broadcast %cst_30 : f32 to vector<8x1280xf32>
      %c0_31 = arith.constant 0 : index
      %c0_32 = arith.constant 0 : index
      %46 = vector.load %arg8[%c0_31, %c0_32] : memref<8x1280xf32, #tpu.memory_space<vmem>>, vector<8x1280xf32>
      tpu.vector_store %arg8[%c0_31, %c0_32], %45 {strides = array<i32>} : memref<8x1280xf32, #tpu.memory_space<vmem>>, vector<8x1280xf32>,
    } else {
    }
    %c0 = arith.constant 0 : index
    %c0_1 = arith.constant 0 : index
    %c0_2 = arith.constant 0 : index
    %3 = vector.load %arg2[%c0, %c0_1, %c0_2] : memref<8x8x1280xf32, #tpu.memory_space<vmem>>, vector<8x8x1280xf32>
    %c0_3 = arith.constant 0 : index
    %c0_4 = arith.constant 0 : index
    %4 = vector.load %arg3[%c0_3, %c0_4] : memref<1x1280xf32, #tpu.memory_space<vmem>>, vector<1x1280xf32>
    %c0_5 = arith.constant 0 : index
    %c0_6 = arith.constant 0 : index
    %5 = memref.load %arg4[%c0_5, %c0_6] : memref<1x1xf32, #tpu.memory_space<smem>>
    %6 = vector.shape_cast %4 : vector<1x1280xf32> to vector<1x1x1280xf32>
    %7 = vector.broadcast %6 : vector<1x1x1280xf32> to vector<8x8x1280xf32>
    %8 = arith.mulf %3, %7 : vector<8x8x1280xf32>
    %cst = arith.constant dense<0.000000e+00> : vector<8x8xf32>
    %9 = vector.multi_reduction <add>, %8, %cst [2] : vector<8x8x1280xf32> to vector<8x8xf32>
    %10 = vector.broadcast %5 : f32 to vector<8x8xf32>
    %11 = arith.addf %9, %10 : vector<8x8xf32>
    %12 = math.tanh %11 : vector<8x8xf32>
    %c0_7 = arith.constant 0 : index
    %c0_8 = arith.constant 0 : index
    %13 = vector.load %arg6[%c0_7, %c0_8] : memref<8x1xf32, #tpu.memory_space<vmem>>, vector<8x1xf32>
    %cst_9 = arith.constant dense<0xFF800000> : vector<8xf32>
    %14 = vector.multi_reduction <maximumf>, %12, %cst_9 [1] : vector<8x8xf32> to vector<8xf32>
    %15 = vector.shape_cast %14 : vector<8xf32> to vector<8x1xf32>
    %16 = arith.maximumf %13, %15 : vector<8x1xf32>
    %17 = arith.subf %13, %16 : vector<8x1xf32>
    %18 = math.exp %17 : vector<8x1xf32>
    %19 = vector.broadcast %16 : vector<8x1xf32> to vector<8x8xf32>
    %20 = arith.subf %12, %19 : vector<8x8xf32>
    %21 = math.exp %20 : vector<8x8xf32>
    %c0_10 = arith.constant 0 : index
    %c0_11 = arith.constant 0 : index
    %22 = vector.load %arg7[%c0_10, %c0_11] : memref<8x1xf32, #tpu.memory_space<vmem>>, vector<8x1xf32>
    %23 = arith.mulf %18, %22 : vector<8x1xf32>
    %cst_12 = arith.constant dense<0.000000e+00> : vector<8xf32>
    %24 = vector.multi_reduction <add>, %21, %cst_12 [1] : vector<8x8xf32> to vector<8xf32>
    %25 = vector.shape_cast %24 : vector<8xf32> to vector<8x1xf32>
    %26 = arith.addf %23, %25 : vector<8x1xf32>
    %c0_13 = arith.constant 0 : index
    %c0_14 = arith.constant 0 : index
    %27 = vector.load %arg7[%c0_13, %c0_14] : memref<8x1xf32, #tpu.memory_space<vmem>>, vector<8x1xf32>
    tpu.vector_store %arg7[%c0_13, %c0_14], %26 {strides = array<i32>} : memref<8x1xf32, #tpu.memory_space<vmem>>, vector<8x1xf32>,
    %c0_15 = arith.constant 0 : index
    %c0_16 = arith.constant 0 : index
    %28 = vector.load %arg8[%c0_15, %c0_16] : memref<8x1280xf32, #tpu.memory_space<vmem>>, vector<8x1280xf32>
    %29 = vector.broadcast %18 : vector<8x1xf32> to vector<8x1280xf32>
    %30 = arith.mulf %29, %28 : vector<8x1280xf32>
    %31 = vector.shape_cast %21 : vector<8x8xf32> to vector<8x8x1xf32>
    %32 = vector.broadcast %31 : vector<8x8x1xf32> to vector<8x8x1280xf32>
    %33 = arith.mulf %3, %32 : vector<8x8x1280xf32>
    %cst_17 = arith.constant dense<0.000000e+00> : vector<8x1280xf32>
    %34 = vector.multi_reduction <add>, %33, %cst_17 [1] : vector<8x8x1280xf32> to vector<8x1280xf32>
    %35 = arith.addf %30, %34 : vector<8x1280xf32>
    %c0_18 = arith.constant 0 : index
    %c0_19 = arith.constant 0 : index
    %36 = vector.load %arg8[%c0_18, %c0_19] : memref<8x1280xf32, #tpu.memory_space<vmem>>, vector<8x1280xf32>
    tpu.vector_store %arg8[%c0_18, %c0_19], %35 {strides = array<i32>} : memref<8x1280xf32, #tpu.memory_space<vmem>>, vector<8x1280xf32>,
    %c0_20 = arith.constant 0 : index
    %c0_21 = arith.constant 0 : index
    %37 = vector.load %arg6[%c0_20, %c0_21] : memref<8x1xf32, #tpu.memory_space<vmem>>, vector<8x1xf32>
    tpu.vector_store %arg6[%c0_20, %c0_21], %16 {strides = array<i32>} : memref<8x1xf32, #tpu.memory_space<vmem>>, vector<8x1xf32>,
    %c0_i32_22 = arith.constant 0 : i32
    %38 = arith.cmpi eq, %arg1, %c0_i32_22 : i32
    %39 = arith.extui %38 : i1 to i32
    %c0_i32_23 = arith.constant 0 : i32
    %40 = arith.cmpi ne, %39, %c0_i32_23 : i32
    scf.if %40 {
      %c0_24 = arith.constant 0 : index
      %c0_25 = arith.constant 0 : index
      %41 = vector.load %arg8[%c0_24, %c0_25] : memref<8x1280xf32, #tpu.memory_space<vmem>>, vector<8x1280xf32>
      %c0_26 = arith.constant 0 : index
      %c0_27 = arith.constant 0 : index
      %42 = vector.load %arg7[%c0_26, %c0_27] : memref<8x1xf32, #tpu.memory_space<vmem>>, vector<8x1xf32>
      %43 = vector.broadcast %42 : vector<8x1xf32> to vector<8x1280xf32>
      %44 = arith.divf %41, %43 : vector<8x1280xf32>
      %c0_28 = arith.constant 0 : index
      %c0_29 = arith.constant 0 : index
      %45 = vector.load %arg5[%c0_28, %c0_29] : memref<8x1280xf32, #tpu.memory_space<vmem>>, vector<8x1280xf32>
      tpu.vector_store %arg5[%c0_28, %c0_29], %44 {strides = array<i32>} : memref<8x1280xf32, #tpu.memory_space<vmem>>, vector<8x1280xf32>,
    } else {
    }
    return
  }
  func.func @transform_0(%arg0: i32, %arg1: i32) -> (i32, i32, i32) {
    %c0_i32 = arith.constant 0 : i32
    %c0_i32_0 = arith.constant 0 : i32
    return %arg0, %arg1, %c0_i32 : i32, i32, i32
  }
  func.func @transform_1(%arg0: i32, %arg1: i32) -> (i32, i32) {
    %c0_i32 = arith.constant 0 : i32
    %c0_i32_0 = arith.constant 0 : i32
    %c0_i32_1 = arith.constant 0 : i32
    return %c0_i32, %c0_i32_0 : i32, i32
  }
  func.func @transform_2(%arg0: i32, %arg1: i32) -> (i32, i32) {
    %c0_i32 = arith.constant 0 : i32
    %c0_i32_0 = arith.constant 0 : i32
    %c0_i32_1 = arith.constant 0 : i32
    return %c0_i32, %c0_i32_0 : i32, i32
  }
  func.func @transform_3(%arg0: i32, %arg1: i32) -> (i32, i32) {
    %c0_i32 = arith.constant 0 : i32
    %c0_i32_0 = arith.constant 0 : i32
    return %arg0, %c0_i32 : i32, i32
  }
}

</mosaic_0001>

<bundles_post_ra>
// kernel: tpu_custom_call.1
= control target key start
LH: loop header
LB: loop body
LE: loop exit
PB: predicated region body
PF: predicated region fallthrough
CT: control target
= control target key end

     0   :  { %9 = vsyncpa [#allocation7], 0  ;;  %s2324_s0 = inlined_call_operand.hbm [shape: f32[8,8,1280], index: 0, kind: input, shape index: {}]   ;;  %s2325_s1 = inlined_call_operand.hbm [shape: f32[1,1280], index: 1, kind: input, shape index: {}]   ;;  %s2326_s2 = inlined_call_operand.<no memory space> [shape: f32[1,1], index: 2, kind: input, shape index: {}]   ;;  %s2327_s3 = inlined_call_operand.hbm [shape: f32[8,1280], index: 3, kind: output, shape index: {}]  }
   0x1   :  { %10 = vsyncpa [#allocation10], 0 }
   0x2   :  { %11 = vsyncpa [#allocation8], 0  ;;  %s1594_s12 = smov [#allocation6]   ;;  %s1522_s16 = scalar_lea.hbm %s2324_s0, 10240 }
   0x3   :  { %s17_s13 = sshll.u32 %s1594_s12, 4  ;;  %p1523_p0 = scmp.ne.s32.totalorder %s2324_s0, %s1522_s16  ;;  %s18_s13 = int_to_ptr.vmem [resolvable:$true] %s17_s13 }
   0x4   :  { %p1526_p1 = scmp.lt.u32.totalorder %s1522_s16, %s2324_s0 }
   0x6   :  { %p1528_p2 = pnand %p1526_p1, %p1523_p0 }
   0x8   :  { %1531 = shalt.err (!%p1528_p2)
}
   0x9   :  { %s1532_s21 = scalar_lea.vmem %s18_s13, 10240  ;;  %p1537_p4 = scmp.lt.s32.totalorder %s18_s13, %s18_s13 }
   0xa   :  { %p1533_p3 = scmp.ne.s32.totalorder %s18_s13, %s1532_s21  ;;  %p1538_p5 = scmp.lt.s32.totalorder %s1532_s21, %s1532_s21 }
   0xc   :  { %p1539_p6 = por %p1538_p5, %p1537_p4 }
   0xe   :  { %p1540_p7 = pnand %p1539_p6, %p1533_p3 }
  0x10   :  { %1543 = shalt.err (!%p1540_p7)
}
  0x11   :  { %s1595_s22 = smov 1280   ;;  %s1596_s23 = smov 80  }
  0x12   :  { %23 = dma.hbm_to_vmem [thread:$0]  %s2324_s0, 10240, %s18_s13, [#allocation7], %s1595_s22, %s1595_s22, %s1596_s23  }
  0x13   :  { %s1597_s26 = smov [#allocation9]   ;;  %s1544_s30 = scalar_lea.hbm %s2325_s1, 160 }
  0x14   :  { %s30_s27 = sshll.u32 %s1597_s26, 4  ;;  %p1545_p8 = scmp.ne.s32.totalorder %s2325_s1, %s1544_s30  ;;  %s31_s27 = int_to_ptr.vmem [resolvable:$true] %s30_s27 }
  0x15   :  { %p1548_p9 = scmp.lt.u32.totalorder %s1544_s30, %s2325_s1 }
  0x17   :  { %p1550_p10 = pnand %p1548_p9, %p1545_p8 }
  0x19   :  { %1553 = shalt.err (!%p1550_p10)
}
  0x1a   :  { %s1554_s8 = scalar_lea.vmem %s31_s27, 160  ;;  %p1559_p12 = scmp.lt.s32.totalorder %s31_s27, %s31_s27 }
  0x1b   :  { %p1555_p11 = scmp.ne.s32.totalorder %s31_s27, %s1554_s8  ;;  %p1560_p13 = scmp.lt.s32.totalorder %s1554_s8, %s1554_s8 }
  0x1d   :  { %p1561_p0 = por %p1560_p13, %p1559_p12 }
  0x1f   :  { %p1562_p1 = pnand %p1561_p0, %p1555_p11 }
  0x21   :  { %1565 = shalt.err (!%p1562_p1)
}
  0x22   :  { %33 = dma.hbm_to_vmem [thread:$0]  %s2325_s1, 160, %s31_s27, [#allocation10]  }
  0x23   :  { %1588 = dma.done.wait [#allocation7], 10240  }
  0x24   :  { %1589 = vsyncadd [#allocation7], 4294957056 }
  0x25   :  { %1590 = dma.done.wait [#allocation10], 160  }
  0x26   :  { %1591 = vsyncadd [#allocation10], 4294967136  ;;  %v144_v0 = vlaneseq  ;;  %v1659_v8 = vld [vmem:[#allocation6] sm:$0xff]  ;;  %v1661_v9 = vld [vmem:[#allocation6 + $0x8] sm:$0xff]  ;;  %vm46_vm0 = vcmask 7168   ;;  %vm422_vm1 = vcmask 1041409  }
  0x27   :  { %v139_v10 = vld [vmem:[#allocation9] sm:$0xff]  ;;  %v1666_v14 = vld [vmem:[#allocation6 + $0x10] sm:$0xff]  ;;  %v140_v19 = vld [vmem:[#allocation9 + $0x8] sm:$0x3]  ;;  %vm424_vm2 = vcmask 1042434   ;;  %vm426_vm3 = vcmask 1043459  }
  0x28   :  { %v389_v1 = vand.u32 127, %v144_v0  ;;  %v1646_v2 = vshrl.u32 %v144_v0, 7  ;;  %v1683_v21 = vld [vmem:[#allocation6 + $0x18] sm:$0xff]  ;;  %v79_v24 = vld [vmem:[#allocation6 + $0xa0] sm:$0xff]  ;;  %v80_v25 = vld [vmem:[#allocation6 + $0xa8] sm:$0xff]  ;;  %vm428_vm4 = vcmask 1044484  }
  0x29   :  { %v81_v30 = vld [vmem:[#allocation6 + $0xb0] sm:$0xff]  ;;  %v1703_v31 = vld [vmem:[#allocation6 + $0x20] sm:$0xff]  ;;  %v1705_v32 = vld [vmem:[#allocation6 + $0x28] sm:$0xff]  ;;  %vm430_vm5 = vcmask 1045509   ;;  %vm432_vm6 = vcmask 1046534   ;;  %vm434_vm7 = vcmask 1047559  }
  0x2a   :  { %v1649_v3 = vsub.s32 %v389_v1, %v1646_v2  ;;  %v1652_v4 = vsub.s32 0, %v1646_v2  ;;  %v1655_v5 = vsub.s32 1, %v1646_v2  ;;  %v2333_v6 = vsub.s32 2, %v1646_v2  ;;  %2347 = vst [vmem:[#allocation15_spill] sm:$0xff] %v1703_v31  ;;  %2348 = vst [vmem:[#allocation16_spill] sm:$0xff] %v1705_v32  ;;  %v1707_v33 = vld [vmem:[#allocation6 + $0x30] sm:$0xff] }
  0x2b   :  { %v2332_v7 = vsub.s32 3, %v1646_v2  ;;  %v2331_v11 = vsub.s32 4, %v1646_v2  ;;  %v2330_v12 = vsub.s32 5, %v1646_v2  ;;  %v2329_v13 = vsub.s32 6, %v1646_v2  ;;  %2349 = vst [vmem:[#allocation17_spill] sm:$0xff] %v1707_v33  ;;  %v1718_v38 = vld [vmem:[#allocation6 + $0xb8] sm:$0xff] }
  0x2c   :  { %v1669_v15 = vrot.slane %v139_v10, %v1652_v4  ;;  %v1672_v16 = vrot.slane %v139_v10, %v1655_v5  ;;  %v1676_v17 = vrot.slane %v139_v10, %v2333_v6  ;;  %v2328_v18 = vsub.s32 7, %v1646_v2  ;;  %2350 = vst [vmem:[#allocation18_spill] sm:$0xff] %v1718_v38  ;;  %v1722_v41 = vld [vmem:[#allocation6 + $0x50] sm:$0xff]  ;;  %v1724_v42 = vld [vmem:[#allocation6 + $0x58] sm:$0xff]  ;;  %v1728_v44 = vld [vmem:[#allocation6 + $0x40] sm:$0xff] }
  0x2d   :  { %v1681_v20 = vrot.slane %v139_v10, %v2332_v7  ;;  %v1691_v26 = vrot.slane %v139_v10, %v2331_v11  ;;  %v1695_v27 = vrot.slane %v139_v10, %v2330_v12  ;;  %v1699_v28 = vrot.slane %v139_v10, %v2329_v13  ;;  %v1726_v43 = vld [vmem:[#allocation6 + $0x38] sm:$0xff]  ;;  %2352 = vst [vmem:[#allocation20_spill] sm:$0xff] %v1728_v44  ;;  %v1734_v47 = vld [vmem:[#allocation6 + $0x60] sm:$0xff]  ;;  %v1736_v48 = vld [vmem:[#allocation6 + $0x48] sm:$0xff] }
  0x2e   :  { %v194_v22 = vmul.f32 %v1669_v15, %v1659_v8  ;;  %v195_v23 = vmul.f32 %v1672_v16, %v1661_v9  ;;  %v196_v29 = vmul.f32 %v1676_v17, %v1666_v14  ;;  %v1711_v34 = vrot.slane %v139_v10, %v2328_v18  ;;  %2351 = vst [vmem:[#allocation19_spill] sm:$0xff] %v1726_v43  ;;  %v1744_v53 = vld [vmem:[#allocation6 + $0xc0] sm:$0xff]  ;;  %v1746_v54 = vld [vmem:[#allocation6 + $0xc8] sm:$0xff]  ;;  %v89_v60 = vld [vmem:[#allocation6 + $0xf0] sm:$0xff] }
  0x2f   :  { %v1714_v35 = vrot.slane %v140_v19, %v1652_v4  ;;  %v197_v36 = vmul.f32 %v1681_v20, %v1683_v21  ;;  %v214_v39 = vmul.f32 %v1669_v15, %v79_v24  ;;  %v215_v40 = vmul.f32 %v1672_v16, %v80_v25  ;;  %2353 = vst [vmem:[#allocation21_spill] sm:$0xff] %v1736_v48  ;;  %v1750_v57 = vld [vmem:[#allocation6 + $0x68] sm:$0xff]  ;;  %v1760_v0 = vld [vmem:[#allocation6 + $0xd0] sm:$0xff]  ;;  %v1762_v1 = vld [vmem:[#allocation6 + $0xd8] sm:$0xff] }
  0x30   :  { %v274_v37 = vadd.f32 %v195_v23, %v194_v22  ;;  %v1731_v45 = vrot.slane %v140_v19, %v1655_v5  ;;  %v216_v46 = vmul.f32 %v1676_v17, %v81_v30  ;;  %v198_v49 = vmul.f32 %v1691_v26, %v1703_v31  ;;  %2354 = vst [vmem:[#allocation22_spill] sm:$0xff] %v1744_v53  ;;  %v90_v19 = vld [vmem:[#allocation6 + $0xf8] sm:$0xff]  ;;  %v91_v30 = vld [vmem:[#allocation6 + $0x100] sm:$0xff] }
  0x31   :  { %v199_v50 = vmul.f32 %v1695_v27, %v1705_v32  ;;  %v200_v51 = vmul.f32 %v1699_v28, %v1707_v33  ;;  %2355 = vst [vmem:[#allocation23_spill] sm:$0xff] %v1746_v54  ;;  %v217_v55 = vmul.f32 %v1681_v20, %v1718_v38  ;;  %v296_v56 = vadd.f32 %v215_v40, %v214_v39  ;;  %v1778_v39 = vld [vmem:[#allocation6 + $0xe8] sm:$0xff]  ;;  %v1780_v40 = vld [vmem:[#allocation6 + $0x78] sm:$0xff]  ;;  %v1790_v7 = vld [vmem:[#allocation6 + $0x80] sm:$0xff] }
  0x32   :  { %v275_v52 = vadd.f32 %v274_v37, %v196_v29  ;;  %v204_v58 = vmul.f32 %v1669_v15, %v1722_v41  ;;  %v205_v59 = vmul.f32 %v1672_v16, %v1724_v42  ;;  %v201_v61 = vmul.f32 %v1711_v34, %v1726_v43  ;;  %2356 = vst [vmem:[#allocation24_spill] sm:$0xff] %v1760_v0  ;;  %v1774_v29 = vld [vmem:[#allocation6 + $0x70] sm:$0xff]  ;;  %v1776_v37 = vld [vmem:[#allocation6 + $0xe0] sm:$0xff] }
  0x33   :  { %v202_v62 = vmul.f32 %v1714_v35, %v1728_v44  ;;  %2357 = vst [vmem:[#allocation25_spill] sm:$0xff] %v1762_v1  ;;  %v206_v10 = vmul.f32 %v1676_v17, %v1734_v47  ;;  %v1768_v22 = vmul.f32 %v1731_v45, %v1736_v48  ;;  %v218_v23 = vmul.f32 %v1691_v26, %v1744_v53  ;;  %v1803_v53 = vld [vmem:[#allocation6 + $0x90] sm:$0xff] }
  0x34   :  { %v276_v63 = vadd.f32 %v275_v52, %v197_v36  ;;  %v219_v24 = vmul.f32 %v1695_v27, %v1746_v54  ;;  %v297_v25 = vadd.f32 %v296_v56, %v216_v46  ;;  %2358 = vst [vmem:[#allocation26_spill] sm:$0xff] %v1776_v37  ;;  %2359 = vst [vmem:[#allocation27_spill] sm:$0xff] %v1778_v39  ;;  %v101_v38 = vld [vmem:[#allocation6 + $0x150] sm:$0xff]  ;;  %vm437_vm8 = vcmask 64512  }
  0x35   :  { %v207_v52 = vmul.f32 %v1681_v20, %v1750_v57  ;;  %v285_v18 = vadd.f32 %v205_v59, %v204_v58  ;;  %v224_v13 = vmul.f32 %v1669_v15, %v89_v60  ;;  %v220_v12 = vmul.f32 %v1699_v28, %v1760_v0  ;;  %v99_v59 = vld [vmem:[#allocation6 + $0x140] sm:$0xff]  ;;  %v100_v60 = vld [vmem:[#allocation6 + $0x148] sm:$0xff] }
  0x36   :  { %v277_v36 = vadd.f32 %v276_v63, %v198_v49  ;;  %v221_v46 = vmul.f32 %v1711_v34, %v1762_v1  ;;  %v298_v56 = vadd.f32 %v297_v25, %v217_v55  ;;  %v92_v49 = vld [vmem:[#allocation6 + $0x108] sm:$0xff]  ;;  %v225_v63 = vmul.f32 %v1672_v16, %v90_v19  ;;  %v93_v19 = vld [vmem:[#allocation6 + $0x110] sm:$0xff] }
  0x37   :  { %v208_v6 = vmul.f32 %v1691_v26, %v1774_v29  ;;  %v286_v54 = vadd.f32 %v285_v18, %v206_v10  ;;  %v226_v58 = vmul.f32 %v1676_v17, %v91_v30  ;;  %v222_v0 = vmul.f32 %v1714_v35, %v1776_v37  ;;  %v1801_v1 = vld [vmem:[#allocation6 + $0x88] sm:$0xff] }
  0x38   :  { %v278_v11 = vadd.f32 %v277_v36, %v199_v50  ;;  %v223_v55 = vmul.f32 %v1731_v45, %v1778_v39  ;;  %v299_v25 = vadd.f32 %v298_v56, %v218_v23  ;;  %v209_v50 = vmul.f32 %v1695_v27, %v1780_v40  ;;  %v94_v39 = vld [vmem:[#allocation6 + $0x118] sm:$0xff] }
  0x39   :  { %v287_v18 = vadd.f32 %v286_v54, %v207_v52  ;;  %v227_v10 = vmul.f32 %v1681_v20, %v92_v49  ;;  %v307_v30 = vadd.f32 %v225_v63, %v224_v13  ;;  %v210_v37 = vmul.f32 %v1699_v28, %v1790_v7  ;;  %v102_v54 = vld [vmem:[#allocation6 + $0x158] sm:$0xff]  ;;  %v103_v49 = vld [vmem:[#allocation6 + $0x160] sm:$0xff] }
  0x3a   :  { %v279_v36 = vadd.f32 %v278_v11, %v200_v51  ;;  %v300_v48 = vadd.f32 %v299_v25, %v219_v24  ;;  %v234_v23 = vmul.f32 %v1669_v15, %v99_v59  ;;  %v235_v56 = vmul.f32 %v1672_v16, %v100_v60  ;;  %v95_v51 = vld [vmem:[#allocation6 + $0x120] sm:$0xff]  ;;  %v109_v60 = vld [vmem:[#allocation6 + $0x190] sm:$0xff] }
  0x3b   :  { %v288_v11 = vadd.f32 %v287_v18, %v208_v6  ;;  %v228_v43 = vmul.f32 %v1691_v26, %v93_v19  ;;  %v308_v33 = vadd.f32 %v307_v30, %v226_v58  ;;  %v211_v13 = vmul.f32 %v1711_v34, %v1801_v1  ;;  %v1817_v58 = vld [vmem:[#allocation6 + $0x98] sm:$0xff] }
  0x3c   :  { %v280_v44 = vadd.f32 %v279_v36, %v201_v61  ;;  %v301_v52 = vadd.f32 %v300_v48, %v220_v12  ;;  %v212_v24 = vmul.f32 %v1714_v35, %v1803_v53  ;;  %v236_v63 = vmul.f32 %v1676_v17, %v101_v38  ;;  %v110_v36 = vld [vmem:[#allocation6 + $0x198] sm:$0xff]  ;;  %v96_v12 = vld [vmem:[#allocation6 + $0x128] sm:$0xff] }
  0x3d   :  { %v289_v25 = vadd.f32 %v288_v11, %v209_v50  ;;  %v229_v61 = vmul.f32 %v1695_v27, %v94_v39  ;;  %v309_v6 = vadd.f32 %v308_v33, %v227_v10  ;;  %v230_v48 = vmul.f32 %v1699_v28, %v95_v51  ;;  %v111_v39 = vld [vmem:[#allocation6 + $0x1a0] sm:$0xff]  ;;  %v97_v50 = vld [vmem:[#allocation6 + $0x130] sm:$0xff]  ;;  %v98_v10 = vld [vmem:[#allocation6 + $0x138] sm:$0xff] }
  0x3e   :  { %v281_v59 = vadd.f32 %v280_v44, %v202_v62  ;;  %v302_v19 = vadd.f32 %v301_v52, %v221_v46  ;;  %v237_v18 = vmul.f32 %v1681_v20, %v102_v54  ;;  %v318_v30 = vadd.f32 %v235_v56, %v234_v23  ;;  %v104_v44 = vld [vmem:[#allocation6 + $0x168] sm:$0xff] }
  0x3f   :  { %v290_v31 = vadd.f32 %v289_v25, %v210_v37  ;;  %v310_v38 = vadd.f32 %v309_v6, %v228_v43  ;;  %v238_v62 = vmul.f32 %v1691_v26, %v103_v49  ;;  %v244_v11 = vmul.f32 %v1669_v15, %v109_v60  ;;  %v105_v37 = vld [vmem:[#allocation6 + $0x170] sm:$0xff]  ;;  %v112_v51 = vld [vmem:[#allocation6 + $0x1a8] sm:$0xff] }
  0x40   :  { %v282_v32 = vadd.f32 %v281_v59, %v1768_v22  ;;  %v303_v33 = vadd.f32 %v302_v19, %v222_v0  ;;  %v319_v46 = vadd.f32 %v318_v30, %v236_v63  ;;  %v245_v52 = vmul.f32 %v1672_v16, %v110_v36  ;;  %v119_v59 = vld [vmem:[#allocation6 + $0x1e0] sm:$0xff]  ;;  %v120_v25 = vld [vmem:[#allocation6 + $0x1e8] sm:$0xff]  ;;  %v121_v30 = vld [vmem:[#allocation6 + $0x1f0] sm:$0xff] }
  0x41   :  { %v213_v23 = vmul.f32 %v1731_v45, %v1817_v58  ;;  %v291_v56 = vadd.f32 %v290_v31, %v211_v13  ;;  %v231_v22 = vmul.f32 %v1711_v34, %v96_v12  ;;  %v311_v43 = vadd.f32 %v310_v38, %v229_v61  ;;  %v106_v31 = vld [vmem:[#allocation6 + $0x178] sm:$0xff]  ;;  %v113_v13 = vld [vmem:[#allocation6 + $0x1b0] sm:$0xff]  ;;  %v107_v61 = vld [vmem:[#allocation6 + $0x180] sm:$0xff] }
  0x42   :  { %283 = vadd.xlane.f32.xlu0 %v282_v32  ;;  %v304_v54 = vadd.f32 %v303_v33, %v223_v55  ;;  %v239_v0 = vmul.f32 %v1695_v27, %v104_v44  ;;  %v320_v49 = vadd.f32 %v319_v46, %v237_v18  ;;  %v246_v63 = vmul.f32 %v1676_v17, %v111_v39  ;;  %v114_v39 = vld [vmem:[#allocation6 + $0x1b8] sm:$0xff] }
  0x43   :  { %v292_v6 = vadd.f32 %v291_v56, %v212_v24  ;;  %v232_v32 = vmul.f32 %v1714_v35, %v97_v50  ;;  %v233_v60 = vmul.f32 %v1731_v45, %v98_v10  ;;  %v312_v36 = vadd.f32 %v311_v43, %v230_v48  ;;  %v122_v24 = vld [vmem:[#allocation6 + $0x1f8] sm:$0xff]  ;;  %v129_v43 = vld [vmem:[#allocation6 + $0x230] sm:$0xff] }
  0x44   :  { %305 = vadd.xlane.f32.xlu1 %v304_v54  ;;  %v240_v19 = vmul.f32 %v1699_v28, %v105_v37  ;;  %v321_v55 = vadd.f32 %v320_v49, %v238_v62  ;;  %v247_v12 = vmul.f32 %v1681_v20, %v112_v51  ;;  %v329_v18 = vadd.f32 %v245_v52, %v244_v11  ;;  %v130_v62 = vld [vmem:[#allocation6 + $0x238] sm:$0xff]  ;;  %v108_v11 = vld [vmem:[#allocation6 + $0x188] sm:$0xff] }
  0x45   :  { %v293_v38 = vadd.f32 %v292_v6, %v213_v23  ;;  %v313_v44 = vadd.f32 %v312_v36, %v231_v22  ;;  %v254_v33 = vmul.f32 %v1669_v15, %v119_v59  ;;  %v255_v50 = vmul.f32 %v1672_v16, %v120_v25  ;;  %v115_v23 = vld [vmem:[#allocation6 + $0x1c0] sm:$0xff] }
  0x46   :  { %v241_v48 = vmul.f32 %v1711_v34, %v106_v31  ;;  %v322_v10 = vadd.f32 %v321_v55, %v239_v0  ;;  %v248_v46 = vmul.f32 %v1691_v26, %v113_v13  ;;  %v330_v56 = vadd.f32 %v329_v18, %v246_v63  ;;  %v123_v59 = vld [vmem:[#allocation6 + $0x200] sm:$0xff]  ;;  %v116_v63 = vld [vmem:[#allocation6 + $0x1c8] sm:$0xff] }
  0x47   :  { %294 = vadd.xlane.f32.xlu0 %v293_v38  ;;  %v314_v37 = vadd.f32 %v313_v44, %v232_v32  ;;  %v242_v52 = vmul.f32 %v1714_v35, %v107_v61  ;;  %v256_v22 = vmul.f32 %v1676_v17, %v121_v30  ;;  %v249_v54 = vmul.f32 %v1695_v27, %v114_v39  ;;  %v131_v25 = vld [vmem:[#allocation6 + $0x240] sm:$0xff]  ;;  %v124_v18 = vld [vmem:[#allocation6 + $0x208] sm:$0xff] }
  0x48   :  { %v323_v51 = vadd.f32 %v322_v10, %v240_v19  ;;  %v331_v49 = vadd.f32 %v330_v56, %v247_v12  ;;  %v257_v0 = vmul.f32 %v1681_v20, %v122_v24  ;;  %v340_v36 = vadd.f32 %v255_v50, %v254_v33  ;;  %v132_v30 = vld [vmem:[#allocation6 + $0x248] sm:$0xff]  ;;  %v117_v12 = vld [vmem:[#allocation6 + $0x1d0] sm:$0xff]  ;;  %v118_v50 = vld [vmem:[#allocation6 + $0x1d8] sm:$0xff] }
  0x49   :  { %v315_v6 = vadd.f32 %v314_v37, %v233_v60  ;;  %v264_v31 = vmul.f32 %v1669_v15, %v129_v43  ;;  %v265_v32 = vmul.f32 %v1672_v16, %v130_v62  ;;  %v243_v13 = vmul.f32 %v1731_v45, %v108_v11  ;;  %v125_v16 = vld [vmem:[#allocation6 + $0x210] sm:$0xff]  ;;  %v126_v11 = vld [vmem:[#allocation6 + $0x218] sm:$0xff] }
  0x4a   :  { %v324_v61 = vadd.f32 %v323_v51, %v241_v48  ;;  %v250_v55 = vmul.f32 %v1699_v28, %v115_v23  ;;  %v332_v19 = vadd.f32 %v331_v49, %v248_v46  ;;  %v258_v38 = vmul.f32 %v1691_v26, %v123_v59  ;;  %v133_v33 = vld [vmem:[#allocation6 + $0x250] sm:$0xff]  ;;  %v134_v23 = vld [vmem:[#allocation6 + $0x258] sm:$0xff]  ;;  %v127_v59 = vld [vmem:[#allocation6 + $0x220] sm:$0xff] }
  0x4b   :  { %316 = vadd.xlane.f32.xlu1 %v315_v6  ;;  %v341_v44 = vadd.f32 %v340_v36, %v256_v22  ;;  %v266_v60 = vmul.f32 %v1676_v17, %v131_v25  ;;  %v251_v15 = vmul.f32 %v1711_v34, %v116_v63  ;;  %v259_v48 = vmul.f32 %v1695_v27, %v124_v18  ;;  %v137_v18 = vld [vmem:[#allocation6 + $0x270] sm:$0xff] }
  0x4c   :  { %v325_v39 = vadd.f32 %v324_v61, %v242_v52  ;;  %v333_v24 = vadd.f32 %v332_v19, %v249_v54  ;;  %v267_v46 = vmul.f32 %v1681_v20, %v132_v30  ;;  %v351_v56 = vadd.f32 %v265_v32, %v264_v31  ;;  %v128_v31 = vld [vmem:[#allocation6 + $0x228] sm:$0xff] }
  0x4d   :  { %v342_v10 = vadd.f32 %v341_v44, %v257_v0  ;;  %v252_v62 = vmul.f32 %v1714_v35, %v117_v12  ;;  %v260_v17 = vmul.f32 %v1699_v28, %v125_v16  ;;  %v268_v22 = vmul.f32 %v1691_v26, %v133_v33  ;;  %v135_v0 = vld [vmem:[#allocation6 + $0x260] sm:$0xff]  ;;  %v136_v32 = vld [vmem:[#allocation6 + $0x268] sm:$0xff] }
  0x4e   :  { %v326_v43 = vadd.f32 %v325_v39, %v243_v13  ;;  %v334_v37 = vadd.f32 %v333_v24, %v250_v55  ;;  %v352_v51 = vadd.f32 %v351_v56, %v266_v60  ;;  %v253_v54 = vmul.f32 %v1731_v45, %v118_v50 }
  0x4f   :  { %v343_v52 = vadd.f32 %v342_v10, %v258_v38  ;;  %v261_v20 = vmul.f32 %v1711_v34, %v126_v11  ;;  %v269_v6 = vmul.f32 %v1695_v27, %v134_v23  ;;  %v262_v13 = vmul.f32 %v1714_v35, %v127_v59  ;;  %v138_v27 = vld [vmem:[#allocation6 + $0x278] sm:$0xff] }
  0x50   :  { %327 = vadd.xlane.f32.xlu0 %v326_v43  ;;  %v335_v49 = vadd.f32 %v334_v37, %v251_v15  ;;  %v353_v63 = vadd.f32 %v352_v51, %v267_v46  ;;  %v270_v26 = vmul.f32 %v1699_v28, %v135_v0  ;;  %v263_v30 = vmul.f32 %v1731_v45, %v128_v31 }
  0x51   :  { %v344_v25 = vadd.f32 %v343_v52, %v259_v48  ;;  %v271_v38 = vmul.f32 %v1711_v34, %v136_v32  ;;  %v272_v39 = vmul.f32 %v1714_v35, %v137_v18  ;;  %v273_v16 = vmul.f32 %v1731_v45, %v138_v27 }
  0x52   :  { %v336_v36 = vadd.f32 %v335_v49, %v252_v62  ;;  %v354_v55 = vadd.f32 %v353_v63, %v268_v22  ;;  %v1598_v48 = vmov -inf   ;;  %v362_v35 = vstv %s2326_s2  ;;  %s1601_s2 = smov [#allocation11]  }
  0x53   :  { %v345_v61 = vadd.f32 %v344_v25, %v260_v17  ;;  %47 = vst.msk [vmem:[#allocation2] sm:$0xff] %vm46_vm0, %v1598_v48  ;;  %s1413_s11 = sshll.u32 %s1601_s2, 4  ;;  %s1414_s11 = int_to_ptr.vmem [resolvable:$true] %s1413_s11 }
  0x54   :  { %v337_v19 = vadd.f32 %v336_v36, %v253_v54  ;;  %v355_v44 = vadd.f32 %v354_v55, %v269_v6  ;;  %s1566_s12 = scalar_lea.vmem %s1414_s11, 1280  ;;  %p1571_p3 = scmp.lt.s32.totalorder %s1414_s11, %s1414_s11 }
  0x55   :  { %v346_v12 = vadd.f32 %v345_v61, %v261_v20  ;;  %p1567_p2 = scmp.ne.s32.totalorder %s1414_s11, %s1566_s12  ;;  %p1572_p4 = scmp.lt.s32.totalorder %s1566_s12, %s1566_s12 }
  0x56   :  { %338 = vadd.xlane.f32.xlu1 %v337_v19  ;;  %v356_v15 = vadd.f32 %v355_v44, %v270_v26 }
  0x57   :  { %v347_v60 = vadd.f32 %v346_v12, %v262_v13  ;;  %p1573_p5 = por %p1572_p4, %p1571_p3 }
  0x58   :  { %v357_v33 = vadd.f32 %v356_v15, %v271_v38 }
  0x59   :  { %v348_v24 = vadd.f32 %v347_v60, %v263_v30  ;;  %p1574_p6 = pnand %p1573_p5, %p1567_p2 }
  0x5a   :  { %v358_v28 = vadd.f32 %v357_v33, %v272_v39  ;;  %v1883_v33 = vld [vmem:[#allocation2] sm:$0xff] }
  0x5b   :  { %349 = vadd.xlane.f32.xlu0 %v348_v24 }
  0x5c   :  { %v359_v50 = vadd.f32 %v358_v28, %v273_v16  ;;  %v1599_v16 = vmov 0  }
  0x5d   :  { %1431 = vset.pattern.permute.xlu1 %v1599_v16  ;;  %1432 = vset.pattern.permute.xlu0 %v1599_v16 }
  0x5e   :  { %360 = vadd.xlane.f32.xlu1 %v359_v50 }
  0xcf   :  { %v284_v34 = vpop.xlane.xlu0 %283 }
  0xd0   :  { %v363_v43 = vadd.f32 %v362_v35, %v284_v34  ;;  %v1600_v34 = vmov 0.0  }
  0xd1   :  { %v306_v10 = vpop.xlane.xlu1 %305  ;;  %48 = vst.msk [vmem:[#allocation3] sm:$0xff] %vm46_vm0, %v1600_v34 }
  0xd2   :  { %v365_v45 = vadd.f32 %v362_v35, %v306_v10 }
  0xd4   :  { %v295_v46 = vpop.xlane.xlu0 %294 }
  0xd5   :  { %v364_v56 = vadd.f32 %v362_v35, %v295_v46 }
  0xd7   :  { %1433 = vtanh.f32 %v364_v56  ;;  %v2360_v56 = vsub.s32 2, %v1646_v2 }
  0xd8   :  { %v317_v62 = vpop.xlane.xlu1 %316  ;;  %1435 = vtanh.f32 %v363_v43 }
  0xd9   :  { %v366_v37 = vadd.f32 %v362_v35, %v317_v62  ;;  %1437 = vtanh.f32 %v365_v45 }
  0xdb   :  { %1439 = vtanh.f32 %v366_v37  ;;  %v2361_v37 = vsub.s32 3, %v1646_v2 }
  0xdd   :  { %v328_v11 = vpop.xlane.xlu0 %327 }
  0xde   :  { %v367_v23 = vadd.f32 %v362_v35, %v328_v11 }
  0xe0   :  { %1441 = vtanh.f32 %v367_v23 }
  0xe1   :  { %v1434_v22 = vpop.eup %1433 }
  0xe2   :  { %v1436_v51 = vpop.eup %1435  ;;  %v397_v54 = vrot.slane %v1434_v22, %v1649_v3 }
  0xe3   :  { %v339_v17 = vpop.xlane.xlu1 %338  ;;  %v1438_v0 = vpop.eup %1437  ;;  %v393_v20 = vrot.slane %v1436_v51, %v1649_v3 }
  0xe4   :  { %v368_v52 = vadd.f32 %v362_v35, %v339_v17  ;;  %v401_v36 = vrot.slane %v1438_v0, %v1649_v3 }
  0xe5   :  { %v1440_v25 = vpop.eup %1439  ;;  %v423_v63 = vsel %vm422_vm1, %v397_v54, %v393_v20  ;;  %v2362_v54 = vsub.s32 4, %v1646_v2 }
  0xe6   :  { %1443 = vtanh.f32 %v368_v52  ;;  %v405_v13 = vrot.slane %v1440_v25, %v1649_v3  ;;  %v425_v61 = vsel %vm424_vm2, %v401_v36, %v423_v63 }
  0xe8   :  { %v350_v49 = vpop.xlane.xlu0 %349  ;;  %v427_v19 = vsel %vm426_vm3, %v405_v13, %v425_v61 }
  0xe9   :  { %v369_v59 = vadd.f32 %v362_v35, %v350_v49 }
  0xea   :  { %v1442_v32 = vpop.eup %1441 }
  0xeb   :  { %1445 = vtanh.f32 %v369_v59  ;;  %v361_v6 = vpop.xlane.xlu1 %360  ;;  %v409_v55 = vrot.slane %v1442_v32, %v1649_v3 }
  0xec   :  { %v370_v31 = vadd.f32 %v362_v35, %v361_v6 }
  0xed   :  { %v429_v12 = vsel %vm428_vm4, %v409_v55, %v427_v19 }
  0xee   :  { %1447 = vtanh.f32 %v370_v31 }
  0xf0   :  { %v1444_v26 = vpop.eup %1443 }
  0xf1   :  { %v413_v18 = vrot.slane %v1444_v26, %v1649_v3 }
  0xf3   :  { %v431_v44 = vsel %vm430_vm5, %v413_v18, %v429_v12 }
  0xf5   :  { %v1446_v30 = vpop.eup %1445 }
  0xf6   :  { %v417_v38 = vrot.slane %v1446_v30, %v1649_v3 }
  0xf8   :  { %v1448_v27 = vpop.eup %1447  ;;  %v433_v60 = vsel %vm432_vm6, %v417_v38, %v431_v44 }
  0xf9   :  { %v421_v39 = vrot.slane %v1448_v27, %v1649_v3 }
  0xfb   :  { %v435_v15 = vsel %vm434_vm7, %v421_v39, %v433_v60 }
  0xfc   :  { %v438_v24 = vsel %vm437_vm8, %v435_v15, -inf }
  0xfd   :  { %439 = vmax.xlane.f32.xlu0 %v438_v24 }
 0x18a   :  { %v440_v28 = vpop.xlane.xlu0 %439 }
 0x18b   :  { %v1886_v50 = vmax.f32 %v1883_v33, %v440_v28 }
 0x18d   :  { %v442_v48 = vsub.f32 %v1883_v33, %v1886_v50  ;;  %1366 = vst.msk [vmem:[#allocation2] sm:$0xff] %vm46_vm0, %v1886_v50  ;;  %447 = vperm.xlu1 %1431, %v1886_v50  }
 0x20c   :  { %v448_v10 = vpop.permute.xlu1 %447 }
 0x20d   :  { %v452_v46 = vrot.slane %v448_v10, %v1652_v4  ;;  %v456_v35 = vrot.slane %v448_v10, %v1655_v5  ;;  %v460_v43 = vrot.slane %v448_v10, %v2360_v56  ;;  %v464_v11 = vrot.slane %v448_v10, %v2361_v37 }
 0x20e   :  { %v468_v49 = vrot.slane %v448_v10, %v2362_v54  ;;  %v2363_v5 = vsub.s32 5, %v1646_v2 }
 0x20f   :  { %v489_v62 = vsub.f32 %v1436_v51, %v452_v46  ;;  %v490_v45 = vsub.f32 %v1434_v22, %v456_v35  ;;  %v491_v23 = vsub.f32 %v1438_v0, %v460_v43  ;;  %v492_v59 = vsub.f32 %v1440_v25, %v464_v11 }
 0x210   :  { %v472_v20 = vrot.slane %v448_v10, %v2363_v5  ;;  %v493_v6 = vsub.f32 %v1442_v32, %v468_v49  ;;  %v2364_v22 = vsub.s32 6, %v1646_v2  ;;  %v2365_v25 = vsub.s32 7, %v1646_v2 }
 0x211   :  { %v497_v17 = vmul.f32 1.442695, %v489_v62  ;;  %v499_v52 = vmul.f32 1.442695, %v490_v45  ;;  %v501_v4 = vmul.f32 1.442695, %v491_v23 }
 0x212   :  { %v503_v51 = vmul.f32 1.442695, %v492_v59  ;;  %v476_v63 = vrot.slane %v448_v10, %v2364_v22  ;;  %v494_v36 = vsub.f32 %v1444_v26, %v472_v20  ;;  %v505_v0 = vmul.f32 1.442695, %v493_v6 }
 0x213   :  { %1449 = vpow2.f32 %v497_v17  ;;  %v480_v61 = vrot.slane %v448_v10, %v2365_v25  ;;  %v443_v20 = vmul.f32 1.442695, %v442_v48 }
 0x214   :  { %1451 = vpow2.f32 %v499_v52  ;;  %v495_v55 = vsub.f32 %v1446_v30, %v476_v63  ;;  %v507_v19 = vmul.f32 1.442695, %v494_v36 }
 0x215   :  { %1453 = vpow2.f32 %v501_v4  ;;  %v496_v32 = vsub.f32 %v1448_v27, %v480_v61 }
 0x216   :  { %1455 = vpow2.f32 %v503_v51  ;;  %v509_v12 = vmul.f32 1.442695, %v495_v55 }
 0x217   :  { %1457 = vpow2.f32 %v505_v0  ;;  %v511_v26 = vmul.f32 1.442695, %v496_v32 }
 0x218   :  { %1459 = vpow2.f32 %v507_v19 }
 0x219   :  { %1461 = vpow2.f32 %v509_v12 }
 0x21a   :  { %1463 = vpow2.f32 %v511_v26 }
 0x21b   :  { %1465 = vpow2.f32 %v443_v20 }
 0x21d   :  { %v1450_v31 = vpop.eup %1449 }
 0x21e   :  { %v1452_v13 = vpop.eup %1451  ;;  %524 = vperm.xlu0 %1432, %v1450_v31  }
 0x21f   :  { %527 = vperm.xlu1 %1431, %v1452_v13   ;;  %v1454_v18 = vpop.eup %1453 }
 0x220   :  { %v1456_v38 = vpop.eup %1455 }
 0x221   :  { %v1458_v44 = vpop.eup %1457 }
 0x222   :  { %v1460_v60 = vpop.eup %1459 }
 0x223   :  { %530 = vperm.xlu1 %1431, %v1454_v18   ;;  %v1462_v39 = vpop.eup %1461  ;;  %v513_v18 = vld [vmem:[#allocation3] sm:$0xff] }
 0x224   :  { %v1464_v2 = vpop.eup %1463 }
 0x227   :  { %533 = vperm.xlu1 %1431, %v1456_v38  }
 0x22b   :  { %536 = vperm.xlu1 %1431, %v1458_v44  }
 0x22f   :  { %539 = vperm.xlu1 %1431, %v1460_v60  }
 0x233   :  { %542 = vperm.xlu1 %1431, %v1462_v39  }
 0x237   :  { %545 = vperm.xlu1 %1431, %v1464_v2  }
 0x29d   :  { %v1916_v28 = vpop.permute.xlu0 %524 }
 0x29e   :  { %v528_v30 = vpop.permute.xlu1 %527  ;;  %v550_v10 = vrot.slane %v1916_v28, %v1649_v3 }
 0x29f   :  { %v554_v46 = vrot.slane %v528_v30, %v1649_v3  ;;  %v637_v6 = vmul.f32 %v528_v30, %v1724_v42  ;;  %v638_v51 = vmul.f32 %v528_v30, %v1734_v47  ;;  %v639_v22 = vmul.f32 %v528_v30, %v1750_v57  ;;  %v1956_v47 = vpop.eup %1465 }
 0x2a0   :  { %v640_v63 = vmul.f32 %v528_v30, %v1774_v29  ;;  %v641_v36 = vmul.f32 %v528_v30, %v1780_v40  ;;  %v642_v31 = vmul.f32 %v528_v30, %v1790_v7  ;;  %v643_v33 = vmul.f32 %v528_v30, %v1801_v1 }
 0x2a1   :  { %v579_v37 = vsel %vm422_vm1, %v554_v46, %v550_v10  ;;  %v772_v13 = vrot.slane %v637_v6, 4  ;;  %v778_v50 = vrot.slane %v638_v51, 4  ;;  %v784_v48 = vrot.slane %v639_v22, 4 }
 0x2a2   :  { %v1908_v15 = vpop.permute.xlu1 %530  ;;  %v796_v61 = vrot.slane %v641_v36, 4  ;;  %v802_v55 = vrot.slane %v642_v31, 4  ;;  %v644_v57 = vmul.f32 %v528_v30, %v1803_v53  ;;  %v808_v40 = vrot.slane %v643_v33, 4 }
 0x2a3   :  { %v558_v35 = vrot.slane %v1908_v15, %v1649_v3  ;;  %v773_v42 = vadd.f32 %v772_v13, %v637_v6  ;;  %v779_v29 = vadd.f32 %v778_v50, %v638_v51  ;;  %v785_v19 = vadd.f32 %v784_v48, %v639_v22 }
 0x2a4   :  { %v645_v7 = vmul.f32 %v528_v30, %v1817_v58  ;;  %v797_v1 = vadd.f32 %v796_v61, %v641_v36  ;;  %v803_v26 = vadd.f32 %v802_v55, %v642_v31  ;;  %v514_v44 = vmul.f32 %v1956_v47, %v513_v18  ;;  %v2368_v55 = vld [vmem:[#allocation17_spill] sm:$0xff] }
 0x2a5   :  { %v580_v23 = vsel %vm424_vm2, %v558_v35, %v579_v37  ;;  %v774_v38 = vrot.slane %v773_v42, 2  ;;  %v780_v60 = vrot.slane %v779_v29, 2  ;;  %v786_v39 = vrot.slane %v785_v19, 2 }
 0x2a6   :  { %v1910_v24 = vpop.permute.xlu1 %533  ;;  %v809_v2 = vadd.f32 %v808_v40, %v643_v33  ;;  %v814_v10 = vrot.slane %v644_v57, 4  ;;  %v820_v46 = vrot.slane %v645_v7, 4  ;;  %v626_v53 = vmul.f32 %v1916_v28, %v1659_v8 }
 0x2a7   :  { %v562_v56 = vrot.slane %v1910_v24, %v1649_v3  ;;  %v627_v35 = vmul.f32 %v1916_v28, %v1661_v9  ;;  %v628_v58 = vmul.f32 %v1916_v28, %v1666_v14  ;;  %v775_v37 = vadd.f32 %v774_v38, %v773_v42 }
 0x2a8   :  { %v810_v9 = vrot.slane %v809_v2, 2  ;;  %v821_v14 = vadd.f32 %v820_v46, %v645_v7 }
 0x2a9   :  { %v581_v52 = vsel %vm426_vm3, %v562_v56, %v580_v23  ;;  %v2366_v23 = vld [vmem:[#allocation15_spill] sm:$0xff]  ;;  %v712_v20 = vrot.slane %v627_v35, 4  ;;  %v776_v36 = vrot.slane %v775_v37, 1 }
 0x2aa   :  { %v1912_v27 = vpop.permute.xlu1 %536  ;;  %v811_v48 = vadd.f32 %v810_v9, %v809_v2 }
 0x2ab   :  { %v566_v62 = vrot.slane %v1912_v27, %v1649_v3  ;;  %v713_v42 = vadd.f32 %v712_v20, %v627_v35 }
 0x2ad   :  { %v582_v54 = vsel %vm428_vm4, %v566_v62, %v581_v52  ;;  %v798_v62 = vrot.slane %v797_v1, 2  ;;  %v2367_v52 = vld [vmem:[#allocation16_spill] sm:$0xff]  ;;  %v714_v35 = vrot.slane %v713_v42, 2 }
 0x2ae   :  { %v1914_v16 = vpop.permute.xlu1 %539  ;;  %v631_v8 = vmul.f32 %v1916_v28, %v2367_v52 }
 0x2af   :  { %v570_v45 = vrot.slane %v1914_v16, %v1649_v3  ;;  %v799_v51 = vadd.f32 %v798_v62, %v797_v1 }
 0x2b0   :  { %v736_v31 = vrot.slane %v631_v8, 4 }
 0x2b1   :  { %v583_v49 = vsel %vm430_vm5, %v570_v45, %v582_v54  ;;  %v629_v45 = vmul.f32 %v1916_v28, %v1683_v21  ;;  %v781_v54 = vadd.f32 %v780_v60, %v779_v29  ;;  %v718_v21 = vrot.slane %v628_v58, 4  ;;  %v2369_v29 = vld [vmem:[#allocation19_spill] sm:$0xff] }
 0x2b2   :  { %v1918_v34 = vpop.permute.xlu1 %542  ;;  %v737_v1 = vadd.f32 %v736_v31, %v631_v8 }
 0x2b3   :  { %v574_v11 = vrot.slane %v1918_v34, %v1649_v3  ;;  %v724_v22 = vrot.slane %v629_v45, 4  ;;  %v782_v13 = vrot.slane %v781_v54, 1  ;;  %v719_v40 = vadd.f32 %v718_v21, %v628_v58 }
 0x2b5   :  { %v584_v59 = vsel %vm432_vm6, %v574_v11, %v583_v49  ;;  %v804_v11 = vrot.slane %v803_v26, 2  ;;  %v787_v49 = vadd.f32 %v786_v39, %v785_v19  ;;  %v633_v19 = vmul.f32 %v1916_v28, %v2369_v29  ;;  %v2371_v39 = vld [vmem:[#allocation21_spill] sm:$0xff] }
 0x2b6   :  { %v1927_v43 = vpop.permute.xlu1 %545  ;;  %v725_v18 = vadd.f32 %v724_v22, %v629_v45  ;;  %v635_v2 = vmul.f32 %v1916_v28, %v2371_v39  ;;  %v720_v58 = vrot.slane %v719_v40, 2  ;;  %v1986_v52 = vadd.f32 %v782_v13, %v781_v54 }
 0x2b7   :  { %v578_v17 = vrot.slane %v1927_v43, %v1649_v3  ;;  %v636_v3 = vmul.f32 %v528_v30, %v1722_v41  ;;  %v790_v41 = vrot.slane %v640_v63, 4  ;;  %v788_v33 = vrot.slane %v787_v49, 1 }
 0x2b8   :  { %v805_v50 = vadd.f32 %v804_v11, %v803_v26  ;;  %v1980_v26 = vadd.f32 %v776_v36, %v775_v37  ;;  %v748_v45 = vrot.slane %v633_v19, 4  ;;  %v738_v37 = vrot.slane %v737_v1, 2 }
 0x2b9   :  { %v585_v4 = vsel %vm434_vm7, %v578_v17, %v584_v59  ;;  %v766_v0 = vrot.slane %v636_v3, 4  ;;  %v791_v12 = vadd.f32 %v790_v41, %v640_v63  ;;  %v630_v17 = vmul.f32 %v1916_v28, %v2366_v23 }
 0x2ba   :  { %v587_v5 = vsel %vm437_vm8, %v585_v4, 0.0  ;;  %v815_v59 = vadd.f32 %v814_v10, %v644_v57  ;;  %v822_v41 = vrot.slane %v821_v14, 2  ;;  %v632_v57 = vmul.f32 %v1916_v28, %v2368_v55 }
 0x2bb   :  { %588 = vadd.xlane.f32.xlu1 %v587_v5  ;;  %v767_v25 = vadd.f32 %v766_v0, %v636_v3  ;;  %v792_v56 = vrot.slane %v791_v12, 2  ;;  %v706_v5 = vrot.slane %v626_v53, 4  ;;  %v730_v0 = vrot.slane %v630_v17, 4 }
 0x2bc   :  { %v823_v46 = vadd.f32 %v822_v41, %v821_v14  ;;  %v742_v62 = vrot.slane %v632_v57, 4  ;;  %v806_v23 = vrot.slane %v805_v50, 1  ;;  %v1988_v8 = vadd.f32 %v788_v33, %v787_v49 }
 0x2bd   :  { %v768_v32 = vrot.slane %v767_v25, 2  ;;  %v793_v6 = vadd.f32 %v792_v56, %v791_v12  ;;  %v707_v61 = vadd.f32 %v706_v5, %v626_v53  ;;  %v731_v12 = vadd.f32 %v730_v0, %v630_v17 }
 0x2be   :  { %v726_v56 = vrot.slane %v725_v18, 2  ;;  %v715_v5 = vadd.f32 %v714_v35, %v713_v42  ;;  %v721_v20 = vadd.f32 %v720_v58, %v719_v40  ;;  %v743_v21 = vadd.f32 %v742_v62, %v632_v57  ;;  %v1469_v40 = vld [vmem:[#allocation6 + $0xa0] sm:$0xff] }
 0x2bf   :  { %v769_v30 = vadd.f32 %v768_v32, %v767_v25  ;;  %v816_v25 = vrot.slane %v815_v59, 2  ;;  %v794_v7 = vrot.slane %v793_v6, 1  ;;  %v800_v32 = vrot.slane %v799_v51, 1 }
 0x2c0   :  { %v708_v53 = vrot.slane %v707_v61, 2  ;;  %v732_v17 = vrot.slane %v731_v12, 2  ;;  %v749_v22 = vadd.f32 %v748_v45, %v633_v19  ;;  %v739_v31 = vadd.f32 %v738_v37, %v737_v1  ;;  %v2372_v1 = vld [vmem:[#allocation18_spill] sm:$0xff] }
 0x2c1   :  { %v770_v63 = vrot.slane %v769_v30, 1  ;;  %v817_v10 = vadd.f32 %v816_v25, %v815_v59  ;;  %v1992_v36 = vadd.f32 %v800_v32, %v799_v51  ;;  %v1995_v54 = vadd.f32 %v806_v23, %v805_v50  ;;  %v1470_v50 = vld [vmem:[#allocation6 + $0xa8] sm:$0xff]  ;;  %v1471_v32 = vld [vmem:[#allocation6 + $0xb0] sm:$0xff] }
 0x2c2   :  { %v709_v14 = vadd.f32 %v708_v53, %v707_v61  ;;  %v733_v0 = vadd.f32 %v732_v17, %v731_v12  ;;  %v716_v42 = vrot.slane %v715_v5, 1  ;;  %v744_v51 = vrot.slane %v743_v21, 2 }
 0x2c3   :  { %v1978_v38 = vadd.f32 %v770_v63, %v769_v30  ;;  %v812_v30 = vrot.slane %v811_v48, 1  ;;  %v818_v59 = vrot.slane %v817_v10, 1  ;;  %v1990_v63 = vadd.f32 %v794_v7, %v793_v6 }
 0x2c4   :  { %v710_v61 = vrot.slane %v709_v14, 1  ;;  %v722_v6 = vrot.slane %v721_v20, 1  ;;  %v750_v57 = vrot.slane %v749_v22, 2  ;;  %v734_v29 = vrot.slane %v733_v0, 1 }
 0x2c5   :  { %v1997_v49 = vadd.f32 %v812_v30, %v811_v48  ;;  %v1999_v25 = vadd.f32 %v818_v59, %v817_v10  ;;  %v740_v19 = vrot.slane %v739_v31, 1  ;;  %v647_v48 = vmul.f32 %v1470_v50, %v1908_v15  ;;  %v2375_v59 = vld [vmem:[#allocation24_spill] sm:$0xff] }
 0x2c6   :  { %v648_v12 = vmul.f32 %v1471_v32, %v1908_v15  ;;  %v717_v39 = vadd.f32 %v716_v42, %v715_v5  ;;  %v723_v35 = vadd.f32 %v722_v6, %v721_v20  ;;  %v751_v62 = vadd.f32 %v750_v57, %v749_v22 }
 0x2c7   :  { %v735_v45 = vadd.f32 %v734_v29, %v733_v0  ;;  %v832_v30 = vrot.slane %v647_v48, 4  ;;  %v2377_v0 = vld [vmem:[#allocation26_spill] sm:$0xff] }
 0x2c8   :  { %v2022_v22 = vsel %vm422_vm1, %v1980_v26, %v717_v39  ;;  %v2030_v26 = vsel %vm422_vm1, %v1986_v52, %v723_v35 }
 0x2c9   :  { %v2038_v52 = vsel %vm422_vm1, %v1990_v63, %v735_v45 }
 0x348   :  { %v589_v4 = vpop.xlane.xlu1 %588 }
 0x349   :  { %v590_v3 = vadd.f32 %v589_v4, %v514_v44  ;;  %v2370_v44 = vld [vmem:[#allocation20_spill] sm:$0xff]  ;;  %v824_v4 = vrot.slane %v823_v46, 1 }
 0x34a   :  { %v634_v60 = vmul.f32 %v1916_v28, %v2370_v44  ;;  %v760_v28 = vrot.slane %v635_v2, 4  ;;  %v649_v44 = vmul.f32 %v1908_v15, %v2372_v1 }
 0x34b   :  { %592 = vst.msk [vmem:[#allocation3] sm:$0xff] %vm46_vm0, %v590_v3  ;;  %v727_v3 = vadd.f32 %v726_v56, %v725_v18  ;;  %v2001_v41 = vadd.f32 %v824_v4, %v823_v46  ;;  %v2374_v46 = vld [vmem:[#allocation23_spill] sm:$0xff]  ;;  %v745_v56 = vadd.f32 %v744_v51, %v743_v21  ;;  %v652_v4 = vmul.f32 %v1908_v15, %v2375_v59 }
 0x34c   :  { %v754_v9 = vrot.slane %v634_v60, 4  ;;  %v761_v33 = vadd.f32 %v760_v28, %v635_v2  ;;  %v2373_v2 = vld [vmem:[#allocation22_spill] sm:$0xff]  ;;  %v651_v53 = vmul.f32 %v1908_v15, %v2374_v46  ;;  %v844_v28 = vrot.slane %v649_v44, 4 }
 0x34d   :  { %v728_v55 = vrot.slane %v727_v3, 1  ;;  %v650_v10 = vmul.f32 %v1908_v15, %v2373_v2  ;;  %v746_v20 = vrot.slane %v745_v56, 1 }
 0x34e   :  { %v755_v13 = vadd.f32 %v754_v9, %v634_v60  ;;  %v762_v7 = vrot.slane %v761_v33, 2  ;;  %v711_v60 = vadd.f32 %v710_v61, %v709_v14  ;;  %v838_v9 = vrot.slane %v648_v12, 4  ;;  %v2376_v14 = vld [vmem:[#allocation25_spill] sm:$0xff] }
 0x34f   :  { %v729_v58 = vadd.f32 %v728_v55, %v727_v3  ;;  %v653_v5 = vmul.f32 %v1908_v15, %v2376_v14  ;;  %v850_v61 = vrot.slane %v650_v10, 4  ;;  %v856_v42 = vrot.slane %v651_v53, 4 }
 0x350   :  { %v756_v18 = vrot.slane %v755_v13, 2  ;;  %v763_v37 = vadd.f32 %v762_v7, %v761_v33  ;;  %v752_v3 = vrot.slane %v751_v62, 1  ;;  %v2018_v21 = vsel %vm422_vm1, %v1978_v38, %v711_v60 }
 0x351   :  { %v833_v55 = vadd.f32 %v832_v30, %v647_v48  ;;  %v839_v29 = vadd.f32 %v838_v9, %v648_v12  ;;  %v857_v50 = vadd.f32 %v856_v42, %v651_v53  ;;  %v862_v38 = vrot.slane %v652_v4, 4 }
 0x352   :  { %v1380_v11 = vld [vmem:[#allocation3] sm:$0xff]  ;;  %v757_v17 = vadd.f32 %v756_v18, %v755_v13  ;;  %v764_v57 = vrot.slane %v763_v37, 1  ;;  %v868_v18 = vrot.slane %v653_v5, 4  ;;  %v747_v7 = vadd.f32 %v746_v20, %v745_v56 }
 0x353   :  { %1383 = vperm.xlu0 %1432, %v1380_v11   ;;  %v741_v11 = vadd.f32 %v740_v19, %v739_v31  ;;  %v654_v31 = vmul.f32 %v1908_v15, %v2377_v0  ;;  %v2378_v13 = vld [vmem:[#allocation27_spill] sm:$0xff]  ;;  %v845_v19 = vadd.f32 %v844_v28, %v649_v44  ;;  %v753_v32 = vadd.f32 %v752_v3, %v751_v62 }
 0x354   :  { %v655_v33 = vmul.f32 %v1908_v15, %v2378_v13  ;;  %v758_v51 = vrot.slane %v757_v17, 1  ;;  %v2034_v1 = vsel %vm422_vm1, %v1988_v8, %v729_v58  ;;  %v765_v44 = vadd.f32 %v764_v57, %v763_v37 }
 0x355   :  { %v874_v48 = vrot.slane %v654_v31, 4  ;;  %v840_v39 = vrot.slane %v839_v29, 2  ;;  %v846_v2 = vrot.slane %v845_v19, 2  ;;  %v858_v46 = vrot.slane %v857_v50, 2 }
 0x356   :  { %v880_v60 = vrot.slane %v655_v33, 4  ;;  %v759_v12 = vadd.f32 %v758_v51, %v757_v17  ;;  %v863_v53 = vadd.f32 %v862_v38, %v652_v4  ;;  %v869_v56 = vadd.f32 %v868_v18, %v653_v5  ;;  %v1473_v4 = vld [vmem:[#allocation6 + $0xf8] sm:$0xff]  ;;  %v1474_v5 = vld [vmem:[#allocation6 + $0x100] sm:$0xff] }
 0x357   :  { %605 = vperm.xlu0 %1432, %v1956_v47   ;;  %v646_v47 = vmul.f32 %v1469_v40, %v1908_v15  ;;  %v851_v40 = vadd.f32 %v850_v61, %v650_v10  ;;  %v2042_v8 = vsel %vm422_vm1, %v1992_v36, %v741_v11  ;;  %v2046_v35 = vsel %vm422_vm1, %v1995_v54, %v747_v7  ;;  %v1475_v61 = vld [vmem:[#allocation6 + $0x108] sm:$0xff] }
 0x358   :  { %v2050_v58 = vsel %vm422_vm1, %v1997_v49, %v753_v32  ;;  %v875_v30 = vadd.f32 %v874_v48, %v654_v31  ;;  %v881_v17 = vadd.f32 %v880_v60, %v655_v33  ;;  %v2054_v63 = vsel %vm422_vm1, %v1999_v25, %v759_v12  ;;  %v1472_v49 = vld [vmem:[#allocation6 + $0xf0] sm:$0xff] }
 0x359   :  { %v826_v23 = vrot.slane %v646_v47, 4  ;;  %v852_v10 = vrot.slane %v851_v40, 2  ;;  %v2058_v36 = vsel %vm422_vm1, %v2001_v41, %v765_v44  ;;  %v841_v45 = vadd.f32 %v840_v39, %v839_v29  ;;  %v1476_v33 = vld [vmem:[#allocation6 + $0x110] sm:$0xff] }
 0x35a   :  { %v847_v11 = vadd.f32 %v846_v2, %v845_v19  ;;  %v859_v37 = vadd.f32 %v858_v46, %v857_v50  ;;  %v864_v9 = vrot.slane %v863_v53, 2  ;;  %v870_v28 = vrot.slane %v869_v56, 2 }
 0x35b   :  { %v827_v6 = vadd.f32 %v826_v23, %v646_v47  ;;  %v834_v47 = vrot.slane %v833_v55, 2  ;;  %v853_v54 = vadd.f32 %v852_v10, %v851_v40  ;;  %v656_v59 = vmul.f32 %v1472_v49, %v1910_v24 }
 0x35c   :  { %v657_v14 = vmul.f32 %v1473_v4, %v1910_v24  ;;  %v658_v25 = vmul.f32 %v1474_v5, %v1910_v24  ;;  %v659_v42 = vmul.f32 %v1475_v61, %v1910_v24  ;;  %v876_v3 = vrot.slane %v875_v30, 2 }
 0x35d   :  { %v828_v15 = vrot.slane %v827_v6, 2  ;;  %v835_v23 = vadd.f32 %v834_v47, %v833_v55  ;;  %v882_v0 = vrot.slane %v881_v17, 2  ;;  %v842_v31 = vrot.slane %v841_v45, 1  ;;  %v1477_v55 = vld [vmem:[#allocation6 + $0x118] sm:$0xff] }
 0x35e   :  { %v848_v13 = vrot.slane %v847_v11, 1  ;;  %v661_v51 = vmul.f32 %v1477_v55, %v1910_v24  ;;  %v854_v57 = vrot.slane %v853_v54, 1  ;;  %v860_v29 = vrot.slane %v859_v37, 1 }
 0x35f   :  { %v829_v62 = vadd.f32 %v828_v15, %v827_v6  ;;  %v836_v20 = vrot.slane %v835_v23, 1  ;;  %v660_v6 = vmul.f32 %v1476_v33, %v1910_v24  ;;  %v865_v19 = vadd.f32 %v864_v9, %v863_v53 }
 0x360   :  { %v871_v40 = vadd.f32 %v870_v28, %v869_v56  ;;  %v886_v50 = vrot.slane %v656_v59, 4  ;;  %v892_v38 = vrot.slane %v657_v14, 4  ;;  %v898_v18 = vrot.slane %v658_v25, 4 }
 0x361   :  { %v830_v41 = vrot.slane %v829_v62, 1  ;;  %v904_v7 = vrot.slane %v659_v42, 4  ;;  %v837_v15 = vadd.f32 %v836_v20, %v835_v23  ;;  %v877_v47 = vadd.f32 %v876_v3, %v875_v30 }
 0x362   :  { %v883_v48 = vadd.f32 %v882_v0, %v881_v17  ;;  %v843_v60 = vadd.f32 %v842_v31, %v841_v45  ;;  %v849_v12 = vadd.f32 %v848_v13, %v847_v11  ;;  %v910_v44 = vrot.slane %v660_v6, 4  ;;  %v1480_v0 = vld [vmem:[#allocation6 + $0x130] sm:$0xff]  ;;  %v1481_v13 = vld [vmem:[#allocation6 + $0x138] sm:$0xff] }
 0x363   :  { %v831_v32 = vadd.f32 %v830_v41, %v829_v62  ;;  %v916_v39 = vrot.slane %v661_v51, 4  ;;  %v855_v2 = vadd.f32 %v854_v57, %v853_v54  ;;  %v861_v10 = vadd.f32 %v860_v29, %v859_v37 }
 0x364   :  { %v866_v46 = vrot.slane %v865_v19, 1  ;;  %v872_v49 = vrot.slane %v871_v40, 1  ;;  %v887_v4 = vadd.f32 %v886_v50, %v656_v59  ;;  %v893_v5 = vadd.f32 %v892_v38, %v657_v14  ;;  %v1478_v59 = vld [vmem:[#allocation6 + $0x120] sm:$0xff]  ;;  %v1479_v14 = vld [vmem:[#allocation6 + $0x128] sm:$0xff] }
 0x365   :  { %v899_v53 = vadd.f32 %v898_v18, %v658_v25  ;;  %v905_v56 = vadd.f32 %v904_v7, %v659_v42  ;;  %v878_v9 = vrot.slane %v877_v47, 1  ;;  %v884_v28 = vrot.slane %v883_v48, 1  ;;  %v1483_v7 = vld [vmem:[#allocation6 + $0x148] sm:$0xff] }
 0x366   :  { %v2068_v62 = vsel %vm424_vm2, %v831_v32, %v2018_v21  ;;  %v2072_v23 = vsel %vm424_vm2, %v837_v15, %v2022_v22  ;;  %v2076_v30 = vsel %vm424_vm2, %v843_v60, %v2030_v26  ;;  %v2080_v17 = vsel %vm424_vm2, %v849_v12, %v2034_v1 }
 0x367   :  { %v911_v45 = vadd.f32 %v910_v44, %v660_v6  ;;  %v917_v11 = vadd.f32 %v916_v39, %v661_v51  ;;  %v867_v54 = vadd.f32 %v866_v46, %v865_v19  ;;  %v873_v37 = vadd.f32 %v872_v49, %v871_v40  ;;  %v1484_v44 = vld [vmem:[#allocation6 + $0x150] sm:$0xff]  ;;  %v1485_v39 = vld [vmem:[#allocation6 + $0x158] sm:$0xff] }
 0x368   :  { %v662_v21 = vmul.f32 %v1478_v59, %v1910_v24  ;;  %v663_v25 = vmul.f32 %v1479_v14, %v1910_v24  ;;  %v888_v22 = vrot.slane %v887_v4, 2  ;;  %v894_v61 = vrot.slane %v893_v5, 2 }
 0x369   :  { %v900_v42 = vrot.slane %v899_v53, 2  ;;  %v906_v41 = vrot.slane %v905_v56, 2  ;;  %v879_v26 = vadd.f32 %v878_v9, %v877_v47  ;;  %v885_v20 = vadd.f32 %v884_v28, %v883_v48 }
 0x36a   :  { %v2086_v1 = vsel %vm424_vm2, %v855_v2, %v2038_v52  ;;  %v2090_v3 = vsel %vm424_vm2, %v861_v10, %v2042_v8  ;;  %v664_v31 = vmul.f32 %v1480_v0, %v1910_v24  ;;  %v665_v33 = vmul.f32 %v1481_v13, %v1910_v24 }
 0x36b   :  { %v912_v6 = vrot.slane %v911_v45, 2  ;;  %v918_v55 = vrot.slane %v917_v11, 2  ;;  %v2096_v51 = vsel %vm424_vm2, %v867_v54, %v2046_v35  ;;  %v2100_v52 = vsel %vm424_vm2, %v873_v37, %v2050_v58  ;;  %v1482_v35 = vld [vmem:[#allocation6 + $0x140] sm:$0xff] }
 0x36c   :  { %v922_v57 = vrot.slane %v662_v21, 4  ;;  %v928_v29 = vrot.slane %v663_v25, 4  ;;  %v889_v8 = vadd.f32 %v888_v22, %v887_v4  ;;  %v895_v19 = vadd.f32 %v894_v61, %v893_v5  ;;  %v1486_v4 = vld [vmem:[#allocation6 + $0x160] sm:$0xff] }
 0x36d   :  { %v901_v40 = vadd.f32 %v900_v42, %v899_v53  ;;  %v907_v50 = vadd.f32 %v906_v41, %v905_v56  ;;  %v2104_v38 = vsel %vm424_vm2, %v879_v26, %v2054_v63  ;;  %v2108_v24 = vsel %vm424_vm2, %v885_v20, %v2058_v36  ;;  %v1487_v53 = vld [vmem:[#allocation6 + $0x168] sm:$0xff] }
 0x36e   :  { %v666_v18 = vmul.f32 %v1482_v35, %v1912_v27  ;;  %v667_v58 = vmul.f32 %v1483_v7, %v1912_v27  ;;  %v913_v32 = vadd.f32 %v912_v6, %v911_v45  ;;  %v919_v15 = vadd.f32 %v918_v55, %v917_v11  ;;  %v1489_v35 = vld [vmem:[#allocation6 + $0x178] sm:$0xff] }
 0x36f   :  { %v934_v47 = vrot.slane %v664_v31, 4  ;;  %v940_v48 = vrot.slane %v665_v33, 4  ;;  %v923_v60 = vadd.f32 %v922_v57, %v662_v21  ;;  %v929_v12 = vadd.f32 %v928_v29, %v663_v25  ;;  %v1488_v57 = vld [vmem:[#allocation6 + $0x170] sm:$0xff] }
 0x370   :  { %v668_v63 = vmul.f32 %v1484_v44, %v1912_v27  ;;  %v669_v2 = vmul.f32 %v1485_v39, %v1912_v27  ;;  %v890_v36 = vrot.slane %v889_v8, 1  ;;  %v896_v10 = vrot.slane %v895_v19, 1 }
 0x371   :  { %v902_v46 = vrot.slane %v901_v40, 1  ;;  %v908_v49 = vrot.slane %v907_v50, 1  ;;  %v670_v5 = vmul.f32 %v1486_v4, %v1912_v27  ;;  %v671_v56 = vmul.f32 %v1487_v53, %v1912_v27 }
 0x372   :  { %v946_v9 = vrot.slane %v666_v18, 4  ;;  %v952_v28 = vrot.slane %v667_v58, 4  ;;  %v914_v45 = vrot.slane %v913_v32, 1  ;;  %v920_v11 = vrot.slane %v919_v15, 1 }
 0x373   :  { %v935_v54 = vadd.f32 %v934_v47, %v664_v31  ;;  %v941_v37 = vadd.f32 %v940_v48, %v665_v33  ;;  %v924_v59 = vrot.slane %v923_v60, 2  ;;  %v930_v21 = vrot.slane %v929_v12, 2  ;;  %v1490_v33 = vld [vmem:[#allocation6 + $0x180] sm:$0xff]  ;;  %v1491_v47 = vld [vmem:[#allocation6 + $0x188] sm:$0xff] }
 0x374   :  { %v958_v14 = vrot.slane %v668_v63, 4  ;;  %v964_v25 = vrot.slane %v669_v2, 4  ;;  %v891_v22 = vadd.f32 %v890_v36, %v889_v8  ;;  %v897_v61 = vadd.f32 %v896_v10, %v895_v19 }
 0x375   :  { %v903_v42 = vadd.f32 %v902_v46, %v901_v40  ;;  %v909_v41 = vadd.f32 %v908_v49, %v907_v50  ;;  %v947_v26 = vadd.f32 %v946_v9, %v666_v18  ;;  %v953_v20 = vadd.f32 %v952_v28, %v667_v58 }
 0x376   :  { %v970_v0 = vrot.slane %v670_v5, 4  ;;  %v976_v13 = vrot.slane %v671_v56, 4  ;;  %v936_v6 = vrot.slane %v935_v54, 2  ;;  %v942_v55 = vrot.slane %v941_v37, 2 }
 0x377   :  { %v672_v29 = vmul.f32 %v1488_v57, %v1912_v27  ;;  %v673_v31 = vmul.f32 %v1489_v35, %v1912_v27  ;;  %v674_v7 = vmul.f32 %v1490_v33, %v1912_v27  ;;  %v675_v8 = vmul.f32 %v1491_v47, %v1912_v27 }
 0x378   :  { %v959_v19 = vadd.f32 %v958_v14, %v668_v63  ;;  %v965_v40 = vadd.f32 %v964_v25, %v669_v2  ;;  %v915_v50 = vadd.f32 %v914_v45, %v913_v32  ;;  %v921_v18 = vadd.f32 %v920_v11, %v919_v15 }
 0x379   :  { %v925_v58 = vadd.f32 %v924_v59, %v923_v60  ;;  %v931_v48 = vadd.f32 %v930_v21, %v929_v12  ;;  %v948_v44 = vrot.slane %v947_v26, 2  ;;  %v954_v39 = vrot.slane %v953_v20, 2 }
 0x37a   :  { %v971_v36 = vadd.f32 %v970_v0, %v670_v5  ;;  %v977_v10 = vadd.f32 %v976_v13, %v671_v56  ;;  %v937_v46 = vadd.f32 %v936_v6, %v935_v54  ;;  %v943_v49 = vadd.f32 %v942_v55, %v941_v37 }
 0x37b   :  { %v982_v4 = vrot.slane %v672_v29, 4  ;;  %v988_v53 = vrot.slane %v673_v31, 4  ;;  %v960_v9 = vrot.slane %v959_v19, 2  ;;  %v966_v28 = vrot.slane %v965_v40, 2 }
 0x37c   :  { %v994_v57 = vrot.slane %v674_v7, 4  ;;  %v1000_v35 = vrot.slane %v675_v8, 4  ;;  %v926_v33 = vrot.slane %v925_v58, 1  ;;  %v932_v27 = vrot.slane %v931_v48, 1 }
 0x37d   :  { %v1268_v32 = vsel %vm426_vm3, %v891_v22, %v2068_v62  ;;  %v1275_v15 = vsel %vm426_vm3, %v897_v61, %v2072_v23  ;;  %v949_v60 = vadd.f32 %v948_v44, %v947_v26  ;;  %v955_v12 = vadd.f32 %v954_v39, %v953_v20 }
 0x37e   :  { %v972_v63 = vrot.slane %v971_v36, 2  ;;  %v978_v2 = vrot.slane %v977_v10, 2  ;;  %v938_v5 = vrot.slane %v937_v46, 1  ;;  %v944_v56 = vrot.slane %v943_v49, 1 }
 0x37f   :  { %v983_v45 = vadd.f32 %v982_v4, %v672_v29  ;;  %v989_v11 = vadd.f32 %v988_v53, %v673_v31  ;;  %v961_v54 = vadd.f32 %v960_v9, %v959_v19  ;;  %v967_v37 = vadd.f32 %v966_v28, %v965_v40  ;;  %v1495_v4 = vld [vmem:[#allocation6 + $0x1a8] sm:$0xff] }
 0x380   :  { %v995_v59 = vadd.f32 %v994_v57, %v674_v7  ;;  %v1001_v21 = vadd.f32 %v1000_v35, %v675_v8  ;;  %v927_v14 = vadd.f32 %v926_v33, %v925_v58  ;;  %v933_v25 = vadd.f32 %v932_v27, %v931_v48  ;;  %v1496_v27 = vld [vmem:[#allocation6 + $0x1b0] sm:$0xff] }
 0x381   :  { %v1282_v62 = vsel %vm426_vm3, %v903_v42, %v2076_v30  ;;  %v1289_v23 = vsel %vm426_vm3, %v909_v41, %v2080_v17  ;;  %v950_v22 = vrot.slane %v949_v60, 1  ;;  %v956_v61 = vrot.slane %v955_v12, 1 }
 0x382   :  { %v973_v26 = vadd.f32 %v972_v63, %v971_v36  ;;  %v979_v20 = vadd.f32 %v978_v2, %v977_v10  ;;  %v939_v0 = vadd.f32 %v938_v5, %v937_v46  ;;  %v945_v13 = vadd.f32 %v944_v56, %v943_v49  ;;  %v1493_v10 = vld [vmem:[#allocation6 + $0x198] sm:$0xff]  ;;  %v1494_v49 = vld [vmem:[#allocation6 + $0x1a0] sm:$0xff] }
 0x383   :  { %v984_v6 = vrot.slane %v983_v45, 2  ;;  %v990_v55 = vrot.slane %v989_v11, 2  ;;  %v962_v29 = vrot.slane %v961_v54, 1  ;;  %v968_v31 = vrot.slane %v967_v37, 1  ;;  %v1498_v56 = vld [vmem:[#allocation6 + $0x1c0] sm:$0xff] }
 0x384   :  { %v996_v7 = vrot.slane %v995_v59, 2  ;;  %v1002_v47 = vrot.slane %v1001_v21, 2  ;;  %v2130_v8 = vsel %vm426_vm3, %v915_v50, %v2086_v1  ;;  %v2134_v30 = vsel %vm426_vm3, %v921_v18, %v2090_v3 }
 0x385   :  { %v2138_v17 = vsel %vm426_vm3, %v927_v14, %v2096_v51  ;;  %v2142_v42 = vsel %vm426_vm3, %v933_v25, %v2100_v52  ;;  %v951_v41 = vadd.f32 %v950_v22, %v949_v60  ;;  %v957_v19 = vadd.f32 %v956_v61, %v955_v12  ;;  %v1492_v52 = vld [vmem:[#allocation6 + $0x190] sm:$0xff]  ;;  %v1497_v12 = vld [vmem:[#allocation6 + $0x1b8] sm:$0xff] }
 0x386   :  { %v974_v40 = vrot.slane %v973_v26, 1  ;;  %v980_v58 = vrot.slane %v979_v20, 1  ;;  %v2146_v1 = vsel %vm426_vm3, %v939_v0, %v2104_v38  ;;  %v2150_v3 = vsel %vm426_vm3, %v945_v13, %v2108_v24  ;;  %v1500_v25 = vld [vmem:[#allocation6 + $0x1d0] sm:$0xff]  ;;  %v1501_v61 = vld [vmem:[#allocation6 + $0x1d8] sm:$0xff] }
 0x387   :  { %v985_v50 = vadd.f32 %v984_v6, %v983_v45  ;;  %v991_v18 = vadd.f32 %v990_v55, %v989_v11  ;;  %v963_v51 = vadd.f32 %v962_v29, %v961_v54  ;;  %v969_v48 = vadd.f32 %v968_v31, %v967_v37  ;;  %v1499_v11 = vld [vmem:[#allocation6 + $0x1c8] sm:$0xff] }
 0x388   :  { %v997_v44 = vadd.f32 %v996_v7, %v995_v59  ;;  %v1003_v39 = vadd.f32 %v1002_v47, %v1001_v21  ;;  %v676_v36 = vmul.f32 %v1492_v52, %v1914_v16  ;;  %v677_v46 = vmul.f32 %v1493_v10, %v1914_v16 }
 0x389   :  { %v678_v38 = vmul.f32 %v1494_v49, %v1914_v16  ;;  %v679_v53 = vmul.f32 %v1495_v4, %v1914_v16  ;;  %v975_v24 = vadd.f32 %v974_v40, %v973_v26  ;;  %v981_v9 = vadd.f32 %v980_v58, %v979_v20  ;;  %v1503_v4 = vld [vmem:[#allocation6 + $0x1e8] sm:$0xff] }
 0x38a   :  { %v2157_v28 = vsel %vm428_vm4, %v951_v41, %v1268_v32  ;;  %v2160_v57 = vsel %vm428_vm4, %v957_v19, %v1275_v15  ;;  %v986_v35 = vrot.slane %v985_v50, 1  ;;  %v992_v33 = vrot.slane %v991_v18, 1 }
 0x38b   :  { %v680_v60 = vmul.f32 %v1496_v27, %v1914_v16  ;;  %v681_v63 = vmul.f32 %v1497_v12, %v1914_v16  ;;  %v998_v2 = vrot.slane %v997_v44, 1  ;;  %v1004_v5 = vrot.slane %v1003_v39, 1  ;;  %v1506_v12 = vld [vmem:[#allocation6 + $0x200] sm:$0xff] }
 0x38c   :  { %v682_v45 = vmul.f32 %v1498_v56, %v1914_v16  ;;  %v683_v32 = vmul.f32 %v1499_v11, %v1914_v16  ;;  %v1006_v54 = vrot.slane %v676_v36, 4  ;;  %v1012_v37 = vrot.slane %v677_v46, 4 }
 0x38d   :  { %v1018_v15 = vrot.slane %v678_v38, 4  ;;  %v1024_v59 = vrot.slane %v679_v53, 4  ;;  %v2167_v21 = vsel %vm428_vm4, %v963_v51, %v1282_v62  ;;  %v2170_v14 = vsel %vm428_vm4, %v969_v48, %v1289_v23 }
 0x38e   :  { %v684_v22 = vmul.f32 %v1500_v25, %v1914_v16  ;;  %v685_v26 = vmul.f32 %v1501_v61, %v1914_v16  ;;  %v987_v20 = vadd.f32 %v986_v35, %v985_v50  ;;  %v993_v0 = vadd.f32 %v992_v33, %v991_v18  ;;  %v1505_v35 = vld [vmem:[#allocation6 + $0x1f8] sm:$0xff] }
 0x38f   :  { %v1030_v13 = vrot.slane %v680_v60, 4  ;;  %v1036_v6 = vrot.slane %v681_v63, 4  ;;  %v999_v55 = vadd.f32 %v998_v2, %v997_v44  ;;  %v1005_v29 = vadd.f32 %v1004_v5, %v1003_v39  ;;  %v1507_v2 = vld [vmem:[#allocation6 + $0x208] sm:$0xff] }
 0x390   :  { %v1042_v31 = vrot.slane %v682_v45, 4  ;;  %v1048_v7 = vrot.slane %v683_v32, 4  ;;  %v1007_v47 = vadd.f32 %v1006_v54, %v676_v36  ;;  %v1013_v62 = vadd.f32 %v1012_v37, %v677_v46 }
 0x391   :  { %v1019_v41 = vadd.f32 %v1018_v15, %v678_v38  ;;  %v1025_v19 = vadd.f32 %v1024_v59, %v679_v53  ;;  %v2176_v23 = vsel %vm428_vm4, %v975_v24, %v2130_v8  ;;  %v2180_v40 = vsel %vm428_vm4, %v981_v9, %v2134_v30  ;;  %v1504_v9 = vld [vmem:[#allocation6 + $0x1f0] sm:$0xff] }
 0x392   :  { %2379 = vst [vmem:[#allocation15_spill] sm:$0xff] %v2180_v40  ;;  %v1054_v16 = vrot.slane %v684_v22, 4  ;;  %v1060_v58 = vrot.slane %v685_v26, 4  ;;  %v2184_v50 = vsel %vm428_vm4, %v987_v20, %v2138_v17  ;;  %v2188_v18 = vsel %vm428_vm4, %v993_v0, %v2142_v42  ;;  %v1502_v42 = vld [vmem:[#allocation6 + $0x1e0] sm:$0xff] }
 0x393   :  { %2380 = vst [vmem:[#allocation16_spill] sm:$0xff] %v2184_v50  ;;  %2381 = vst [vmem:[#allocation17_spill] sm:$0xff] %v2188_v18  ;;  %v1031_v51 = vadd.f32 %v1030_v13, %v680_v60  ;;  %v1037_v48 = vadd.f32 %v1036_v6, %v681_v63  ;;  %v2192_v8 = vsel %vm428_vm4, %v999_v55, %v2146_v1  ;;  %v1008_v52 = vrot.slane %v1007_v47, 2 }
 0x394   :  { %2382 = vst [vmem:[#allocation19_spill] sm:$0xff] %v2192_v8  ;;  %v2196_v30 = vsel %vm428_vm4, %v1005_v29, %v2150_v3  ;;  %v1043_v44 = vadd.f32 %v1042_v31, %v682_v45  ;;  %v1049_v39 = vadd.f32 %v1048_v7, %v683_v32  ;;  %v1014_v36 = vrot.slane %v1013_v62, 2 }
 0x395   :  { %2383 = vst [vmem:[#allocation20_spill] sm:$0xff] %v2196_v30  ;;  %v1020_v17 = vrot.slane %v1019_v41, 2  ;;  %v1026_v10 = vrot.slane %v1025_v19, 2  ;;  %v1055_v46 = vadd.f32 %v1054_v16, %v684_v22  ;;  %v1061_v49 = vadd.f32 %v1060_v58, %v685_v26 }
 0x396   :  { %v686_v38 = vmul.f32 %v1502_v42, %v1918_v34  ;;  %v687_v53 = vmul.f32 %v1503_v4, %v1918_v34  ;;  %v1032_v1 = vrot.slane %v1031_v51, 2  ;;  %v1038_v24 = vrot.slane %v1037_v48, 2 }
 0x397   :  { %v688_v3 = vmul.f32 %v1504_v9, %v1918_v34  ;;  %v689_v33 = vmul.f32 %v1505_v35, %v1918_v34  ;;  %v1044_v27 = vrot.slane %v1043_v44, 2  ;;  %v1050_v60 = vrot.slane %v1049_v39, 2 }
 0x398   :  { %v690_v63 = vmul.f32 %v1506_v12, %v1918_v34  ;;  %v691_v5 = vmul.f32 %v1507_v2, %v1918_v34  ;;  %v1009_v56 = vadd.f32 %v1008_v52, %v1007_v47  ;;  %v1015_v45 = vadd.f32 %v1014_v36, %v1013_v62  ;;  %v1508_v12 = vld [vmem:[#allocation6 + $0x210] sm:$0xff]  ;;  %v1509_v2 = vld [vmem:[#allocation6 + $0x218] sm:$0xff] }
 0x399   :  { %v1021_v11 = vadd.f32 %v1020_v17, %v1019_v41  ;;  %v1027_v32 = vadd.f32 %v1026_v10, %v1025_v19  ;;  %v1056_v54 = vrot.slane %v1055_v46, 2  ;;  %v1062_v37 = vrot.slane %v1061_v49, 2 }
 0x39a   :  { %v1066_v15 = vrot.slane %v686_v38, 4  ;;  %v1072_v59 = vrot.slane %v687_v53, 4  ;;  %v1033_v25 = vadd.f32 %v1032_v1, %v1031_v51  ;;  %v1039_v22 = vadd.f32 %v1038_v24, %v1037_v48 }
 0x39b   :  { %v1078_v61 = vrot.slane %v688_v3, 4  ;;  %v1084_v26 = vrot.slane %v689_v33, 4  ;;  %v1045_v20 = vadd.f32 %v1044_v27, %v1043_v44  ;;  %v1051_v0 = vadd.f32 %v1050_v60, %v1049_v39 }
 0x39c   :  { %v1090_v13 = vrot.slane %v690_v63, 4  ;;  %v1096_v6 = vrot.slane %v691_v5, 4  ;;  %v1010_v55 = vrot.slane %v1009_v56, 1  ;;  %v1016_v29 = vrot.slane %v1015_v45, 1 }
 0x39d   :  { %v1022_v31 = vrot.slane %v1021_v11, 1  ;;  %v1028_v7 = vrot.slane %v1027_v32, 1  ;;  %v1057_v47 = vadd.f32 %v1056_v54, %v1055_v46  ;;  %v1063_v62 = vadd.f32 %v1062_v37, %v1061_v49 }
 0x39e   :  { %v1067_v41 = vadd.f32 %v1066_v15, %v686_v38  ;;  %v1073_v19 = vadd.f32 %v1072_v59, %v687_v53  ;;  %v1034_v16 = vrot.slane %v1033_v25, 1  ;;  %v1040_v58 = vrot.slane %v1039_v22, 1 }
 0x39f   :  { %v1079_v52 = vadd.f32 %v1078_v61, %v688_v3  ;;  %v1085_v36 = vadd.f32 %v1084_v26, %v689_v33  ;;  %v1046_v51 = vrot.slane %v1045_v20, 1  ;;  %v1052_v48 = vrot.slane %v1051_v0, 1  ;;  %v1512_v61 = vld [vmem:[#allocation6 + $0x230] sm:$0xff] }
 0x3a0   :  { %v1091_v17 = vadd.f32 %v1090_v13, %v690_v63  ;;  %v1097_v10 = vadd.f32 %v1096_v6, %v691_v5  ;;  %v2204_v44 = vadd.f32 %v1010_v55, %v1009_v56  ;;  %v2206_v39 = vadd.f32 %v1016_v29, %v1015_v45  ;;  %v1510_v56 = vld [vmem:[#allocation6 + $0x220] sm:$0xff]  ;;  %v1515_v29 = vld [vmem:[#allocation6 + $0x248] sm:$0xff] }
 0x3a1   :  { %v2208_v42 = vadd.f32 %v1022_v31, %v1021_v11  ;;  %v2210_v4 = vadd.f32 %v1028_v7, %v1027_v32  ;;  %v1058_v46 = vrot.slane %v1057_v47, 1  ;;  %v1064_v49 = vrot.slane %v1063_v62, 1  ;;  %v1511_v11 = vld [vmem:[#allocation6 + $0x228] sm:$0xff]  ;;  %v1514_v6 = vld [vmem:[#allocation6 + $0x240] sm:$0xff] }
 0x3a2   :  { %v1068_v38 = vrot.slane %v1067_v41, 2  ;;  %v1074_v53 = vrot.slane %v1073_v19, 2  ;;  %v2212_v1 = vadd.f32 %v1034_v16, %v1033_v25  ;;  %v2214_v24 = vadd.f32 %v1040_v58, %v1039_v22 }
 0x3a3   :  { %v1080_v9 = vrot.slane %v1079_v52, 2  ;;  %v1086_v3 = vrot.slane %v1085_v36, 2  ;;  %v2216_v35 = vadd.f32 %v1046_v51, %v1045_v20  ;;  %v2218_v33 = vadd.f32 %v1052_v48, %v1051_v0  ;;  %v1513_v20 = vld [vmem:[#allocation6 + $0x238] sm:$0xff]  ;;  %v1518_v51 = vld [vmem:[#allocation6 + $0x260] sm:$0xff] }
 0x3a4   :  { %2384 = vst [vmem:[#allocation21_spill] sm:$0xff] %v2214_v24  ;;  %v1092_v27 = vrot.slane %v1091_v17, 2  ;;  %v1098_v60 = vrot.slane %v1097_v10, 2  ;;  %v692_v63 = vmul.f32 %v1508_v12, %v1918_v34  ;;  %v693_v5 = vmul.f32 %v1509_v2, %v1918_v34 }
 0x3a5   :  { %2385 = vst [vmem:[#allocation18_spill] sm:$0xff] %v2216_v35  ;;  %2386 = vst [vmem:[#allocation22_spill] sm:$0xff] %v2218_v33  ;;  %v694_v45 = vmul.f32 %v1510_v56, %v1918_v34  ;;  %v695_v32 = vmul.f32 %v1511_v11, %v1918_v34  ;;  %v2224_v54 = vadd.f32 %v1058_v46, %v1057_v47 }
 0x3a6   :  { %v2226_v37 = vadd.f32 %v1064_v49, %v1063_v62  ;;  %v2228_v15 = vadd.f32 %v1068_v38, %v1067_v41  ;;  %v2230_v59 = vadd.f32 %v1074_v53, %v1073_v19  ;;  %v2232_v25 = vadd.f32 %v1080_v9, %v1079_v52  ;;  %v1516_v62 = vld [vmem:[#allocation6 + $0x250] sm:$0xff]  ;;  %v1517_v19 = vld [vmem:[#allocation6 + $0x258] sm:$0xff] }
 0x3a7   :  { %2387 = vst [vmem:[#allocation23_spill] sm:$0xff] %v2224_v54  ;;  %v2234_v22 = vadd.f32 %v1086_v3, %v1085_v36  ;;  %v696_v26 = vmul.f32 %v1512_v61, %v1927_v43  ;;  %v697_v0 = vmul.f32 %v1513_v20, %v1927_v43  ;;  %v2238_v13 = vadd.f32 %v1092_v27, %v1091_v17  ;;  %v1520_v53 = vld [vmem:[#allocation6 + $0x270] sm:$0xff]  ;;  %v1521_v3 = vld [vmem:[#allocation6 + $0x278] sm:$0xff] }
 0x3a8   :  { %2388 = vst [vmem:[#allocation24_spill] sm:$0xff] %v2226_v37  ;;  %v2240_v34 = vadd.f32 %v1098_v60, %v1097_v10  ;;  %v698_v55 = vmul.f32 %v1514_v6, %v1927_v43  ;;  %v699_v31 = vmul.f32 %v1515_v29, %v1927_v43  ;;  %v1102_v7 = vrot.slane %v692_v63, 4  ;;  %v1519_v10 = vld [vmem:[#allocation6 + $0x268] sm:$0xff] }
 0x3a9   :  { %v1108_v47 = vrot.slane %v693_v5, 4  ;;  %v700_v41 = vmul.f32 %v1516_v62, %v1927_v43  ;;  %v701_v16 = vmul.f32 %v1517_v19, %v1927_v43  ;;  %v1070_v58 = vrot.slane %v2228_v15, 1 }
 0x3aa   :  { %v1076_v52 = vrot.slane %v2230_v59, 1  ;;  %v1114_v36 = vrot.slane %v694_v45, 4  ;;  %v702_v48 = vmul.f32 %v1518_v51, %v1927_v43  ;;  %v1120_v17 = vrot.slane %v695_v32, 4 }
 0x3ab   :  { %v703_v46 = vmul.f32 %v1519_v10, %v1927_v43  ;;  %v1126_v49 = vrot.slane %v696_v26, 4  ;;  %v1132_v38 = vrot.slane %v697_v0, 4  ;;  %v704_v9 = vmul.f32 %v1520_v53, %v1927_v43 }
 0x3ac   :  { %v705_v27 = vmul.f32 %v1521_v3, %v1927_v43  ;;  %v1138_v60 = vrot.slane %v698_v55, 4  ;;  %v1144_v12 = vrot.slane %v699_v31, 4  ;;  %v1082_v2 = vrot.slane %v2232_v25, 1 }
 0x3ad   :  { %v1088_v56 = vrot.slane %v2234_v22, 1  ;;  %v1150_v11 = vrot.slane %v700_v41, 4  ;;  %v1156_v61 = vrot.slane %v701_v16, 4  ;;  %v1103_v20 = vadd.f32 %v1102_v7, %v692_v63 }
 0x3ae   :  { %v1109_v6 = vadd.f32 %v1108_v47, %v693_v5  ;;  %v1115_v29 = vadd.f32 %v1114_v36, %v694_v45  ;;  %v1162_v62 = vrot.slane %v702_v48, 4  ;;  %v1121_v19 = vadd.f32 %v1120_v17, %v695_v32 }
 0x3af   :  { %v1127_v51 = vadd.f32 %v1126_v49, %v696_v26  ;;  %v1133_v10 = vadd.f32 %v1132_v38, %v697_v0  ;;  %v1168_v37 = vrot.slane %v703_v46, 4  ;;  %v1139_v53 = vadd.f32 %v1138_v60, %v698_v55 }
 0x3b0   :  { %v1145_v30 = vadd.f32 %v1144_v12, %v699_v31  ;;  %v1174_v54 = vrot.slane %v704_v9, 4  ;;  %v1180_v43 = vrot.slane %v705_v27, 4  ;;  %v1094_v3 = vrot.slane %v2238_v13, 1 }
 0x3b1   :  { %v1100_v8 = vrot.slane %v2240_v34, 1  ;;  %v1151_v33 = vadd.f32 %v1150_v11, %v700_v41  ;;  %v1157_v18 = vadd.f32 %v1156_v61, %v701_v16  ;;  %v1104_v35 = vrot.slane %v1103_v20, 2 }
 0x3b2   :  { %v1110_v50 = vrot.slane %v1109_v6, 2  ;;  %v1116_v63 = vrot.slane %v1115_v29, 2  ;;  %v1163_v5 = vadd.f32 %v1162_v62, %v702_v48  ;;  %v1122_v45 = vrot.slane %v1121_v19, 2 }
 0x3b3   :  { %v1128_v7 = vrot.slane %v1127_v51, 2  ;;  %v1134_v32 = vrot.slane %v1133_v10, 2  ;;  %v1169_v26 = vadd.f32 %v1168_v37, %v703_v46  ;;  %v1140_v0 = vrot.slane %v1139_v53, 2 }
 0x3b4   :  { %v1146_v47 = vrot.slane %v1145_v30, 2  ;;  %v1175_v55 = vadd.f32 %v1174_v54, %v704_v9  ;;  %v1181_v31 = vadd.f32 %v1180_v43, %v705_v27  ;;  %v1071_v36 = vadd.f32 %v1070_v58, %v2228_v15 }
 0x3b5   :  { %v1077_v17 = vadd.f32 %v1076_v52, %v2230_v59  ;;  %v1152_v49 = vrot.slane %v1151_v33, 2  ;;  %v1158_v38 = vrot.slane %v1157_v18, 2  ;;  %v1105_v41 = vadd.f32 %v1104_v35, %v1103_v20 }
 0x3b6   :  { %v1111_v16 = vadd.f32 %v1110_v50, %v1109_v6  ;;  %v1117_v60 = vadd.f32 %v1116_v63, %v1115_v29  ;;  %v1164_v12 = vrot.slane %v1163_v5, 2  ;;  %v1123_v11 = vadd.f32 %v1122_v45, %v1121_v19 }
 0x3b7   :  { %v1129_v48 = vadd.f32 %v1128_v7, %v1127_v51  ;;  %v1135_v61 = vadd.f32 %v1134_v32, %v1133_v10  ;;  %v1170_v62 = vrot.slane %v1169_v26, 2  ;;  %v1141_v24 = vadd.f32 %v1140_v0, %v1139_v53 }
 0x3b8   :  { %v1147_v37 = vadd.f32 %v1146_v47, %v1145_v30  ;;  %v1176_v46 = vrot.slane %v1175_v55, 2  ;;  %v1182_v40 = vrot.slane %v1181_v31, 2  ;;  %v1083_v54 = vadd.f32 %v1082_v2, %v2232_v25 }
 0x3b9   :  { %v1089_v15 = vadd.f32 %v1088_v56, %v2234_v22  ;;  %v1153_v58 = vadd.f32 %v1152_v49, %v1151_v33  ;;  %v1159_v59 = vadd.f32 %v1158_v38, %v1157_v18  ;;  %v1106_v52 = vrot.slane %v1105_v41, 1 }
 0x3ba   :  { %v1112_v9 = vrot.slane %v1111_v16, 1  ;;  %v1118_v35 = vrot.slane %v1117_v60, 1  ;;  %v1165_v50 = vadd.f32 %v1164_v12, %v1163_v5  ;;  %v1124_v27 = vrot.slane %v1123_v11, 1 }
 0x3bb   :  { %v1130_v20 = vrot.slane %v1129_v48, 1  ;;  %v1136_v6 = vrot.slane %v1135_v61, 1  ;;  %v1171_v29 = vadd.f32 %v1170_v62, %v1169_v26  ;;  %v1142_v19 = vrot.slane %v1141_v24, 1 }
 0x3bc   :  { %v1148_v51 = vrot.slane %v1147_v37, 1  ;;  %v1177_v10 = vadd.f32 %v1176_v46, %v1175_v55  ;;  %v1183_v30 = vadd.f32 %v1182_v40, %v1181_v31  ;;  %v1095_v53 = vadd.f32 %v1094_v3, %v2238_v13  ;;  %v2391_v46 = vld [vmem:[#allocation16_spill] sm:$0xff] }
 0x3bd   :  { %v1101_v25 = vadd.f32 %v1100_v8, %v2240_v34  ;;  %v1154_v2 = vrot.slane %v1153_v58, 1  ;;  %v1160_v22 = vrot.slane %v1159_v59, 1  ;;  %v1107_v33 = vadd.f32 %v1106_v52, %v1105_v41 }
 0x3be   :  { %v1113_v18 = vadd.f32 %v1112_v9, %v1111_v16  ;;  %v1119_v56 = vadd.f32 %v1118_v35, %v1117_v60  ;;  %v1166_v43 = vrot.slane %v1165_v50, 1  ;;  %v1125_v63 = vadd.f32 %v1124_v27, %v1123_v11  ;;  %v2389_v11 = vld [vmem:[#allocation15_spill] sm:$0xff]  ;;  %v2397_v27 = vld [vmem:[#allocation20_spill] sm:$0xff] }
 0x3bf   :  { %v1131_v5 = vadd.f32 %v1130_v20, %v1129_v48  ;;  %v1137_v45 = vadd.f32 %v1136_v6, %v1135_v61  ;;  %v1172_v7 = vrot.slane %v1171_v29, 1  ;;  %v1143_v32 = vadd.f32 %v1142_v19, %v1141_v24  ;;  %v2390_v48 = vld [vmem:[#allocation21_spill] sm:$0xff]  ;;  %v2395_v9 = vld [vmem:[#allocation19_spill] sm:$0xff]  ;;  %v2398_v20 = vld [vmem:[#allocation24_spill] sm:$0xff] }
 0x3c0   :  { %v1149_v26 = vadd.f32 %v1148_v51, %v1147_v37  ;;  %v1178_v0 = vrot.slane %v1177_v10, 1  ;;  %v1184_v47 = vrot.slane %v1183_v30, 1  ;;  %v1155_v55 = vadd.f32 %v1154_v2, %v1153_v58  ;;  %v2396_v35 = vld [vmem:[#allocation23_spill] sm:$0xff] }
 0x3c1   :  { %v1161_v40 = vadd.f32 %v1160_v22, %v1159_v59  ;;  %v1270_v8 = vsel %vm430_vm5, %v2204_v44, %v2157_v28  ;;  %v1277_v13 = vsel %vm430_vm5, %v2206_v39, %v2160_v57  ;;  %v1167_v34 = vadd.f32 %v1166_v43, %v1165_v50 }
 0x3c2   :  { %v1271_v3 = vsel %vm432_vm6, %v1071_v36, %v1270_v8  ;;  %v1278_v24 = vsel %vm432_vm6, %v1077_v17, %v1277_v13  ;;  %v1173_v49 = vadd.f32 %v1172_v7, %v1171_v29  ;;  %v1284_v16 = vsel %vm430_vm5, %v2208_v42, %v2167_v21 }
 0x3c3   :  { %v1272_v38 = vsel %vm434_vm7, %v1131_v5, %v1271_v3  ;;  %v1279_v41 = vsel %vm434_vm7, %v1137_v45, %v1278_v24  ;;  %v1179_v28 = vadd.f32 %v1178_v0, %v1177_v10  ;;  %v1185_v44 = vadd.f32 %v1184_v47, %v1183_v30 }
 0x3c4   :  { %v1285_v60 = vsel %vm432_vm6, %v1083_v54, %v1284_v16  ;;  %v1291_v57 = vsel %vm430_vm5, %v2210_v4, %v2170_v14  ;;  %v1298_v12 = vsel %vm430_vm5, %v2212_v1, %v2176_v23  ;;  %v1305_v21 = vsel %vm430_vm5, %v2390_v48, %v2389_v11  ;;  %v2392_v54 = vld [vmem:[#allocation18_spill] sm:$0xff]  ;;  %v2393_v23 = vld [vmem:[#allocation17_spill] sm:$0xff] }
 0x3c5   :  { %v1286_v36 = vsel %vm434_vm7, %v1143_v32, %v1285_v60  ;;  %v1292_v17 = vsel %vm432_vm6, %v1089_v15, %v1291_v57  ;;  %v1299_v62 = vsel %vm432_vm6, %v1095_v53, %v1298_v12  ;;  %v1306_v14 = vsel %vm432_vm6, %v1101_v25, %v1305_v21  ;;  %v2394_v1 = vld [vmem:[#allocation22_spill] sm:$0xff] }
 0x3c6   :  { %v1293_v61 = vsel %vm434_vm7, %v1149_v26, %v1292_v17  ;;  %v1300_v4 = vsel %vm434_vm7, %v1155_v55, %v1299_v62  ;;  %v1307_v37 = vsel %vm434_vm7, %v1161_v40, %v1306_v14  ;;  %v1312_v15 = vsel %vm430_vm5, %v2392_v54, %v2391_v46 }
 0x3c7   :  { %v1319_v58 = vsel %vm430_vm5, %v2394_v1, %v2393_v23  ;;  %v1313_v59 = vsel %vm432_vm6, %v1107_v33, %v1312_v15  ;;  %v1326_v50 = vsel %vm430_vm5, %v2396_v35, %v2395_v9  ;;  %v1333_v6 = vsel %vm430_vm5, %v2398_v20, %v2397_v27 }
 0x3c8   :  { %v1320_v52 = vsel %vm432_vm6, %v1113_v18, %v1319_v58  ;;  %v1314_v29 = vsel %vm434_vm7, %v1167_v34, %v1313_v59  ;;  %v1327_v51 = vsel %vm432_vm6, %v1119_v56, %v1326_v50  ;;  %v1334_v10 = vsel %vm432_vm6, %v1125_v63, %v1333_v6 }
 0x3c9   :  { %v1321_v19 = vsel %vm434_vm7, %v1173_v49, %v1320_v52  ;;  %v1328_v30 = vsel %vm434_vm7, %v1179_v28, %v1327_v51  ;;  %v1335_v53 = vsel %vm434_vm7, %v1185_v44, %v1334_v10 }
 0x3d2   :  { %v1384_v31 = vpop.permute.xlu0 %1383 }
 0x3d3   :  { %1467 = vrcp.f32 %v1384_v31 }
 0x3d6   :  { %v606_v39 = vpop.permute.xlu0 %605 }
 0x3d7   :  { %v608_v42 = vmul.f32 0.0, %v606_v39 }
 0x3d9   :  { %v1346_v25 = vadd.f32 %v1272_v38, %v608_v42  ;;  %v1347_v2 = vadd.f32 %v1279_v41, %v608_v42  ;;  %v1348_v22 = vadd.f32 %v1286_v36, %v608_v42  ;;  %v1349_v33 = vadd.f32 %v1293_v61, %v608_v42 }
 0x3da   :  { %v1350_v18 = vadd.f32 %v1300_v4, %v608_v42  ;;  %v1351_v43 = vadd.f32 %v1307_v37, %v608_v42  ;;  %v1352_v45 = vadd.f32 %v1314_v29, %v608_v42  ;;  %v1353_v7 = vadd.f32 %v1321_v19, %v608_v42 }
 0x3db   :  { %v1354_v32 = vadd.f32 %v1328_v30, %v608_v42  ;;  %v1355_v26 = vadd.f32 %v1335_v53, %v608_v42 }
 0x3dd   :  { %v1468_v5 = vpop.eup %1467 }
 0x3de   :  { %v1387_v56 = vmul.f32 %v1468_v5, %v1346_v25  ;;  %v1388_v0 = vmul.f32 %v1468_v5, %v1347_v2  ;;  %v1389_v63 = vmul.f32 %v1468_v5, %v1348_v22  ;;  %v1390_v47 = vmul.f32 %v1468_v5, %v1349_v33 }
 0x3df   :  { %v1391_v55 = vmul.f32 %v1468_v5, %v1350_v18  ;;  %v1392_v40 = vmul.f32 %v1468_v5, %v1351_v43  ;;  %v1393_v31 = vmul.f32 %v1468_v5, %v1352_v45  ;;  %v1394_v8 = vmul.f32 %v1468_v5, %v1353_v7 }
 0x3e0   :  { %v1395_v13 = vmul.f32 %v1468_v5, %v1354_v32  ;;  %v1396_v34 = vmul.f32 %v1468_v5, %v1355_v26  ;;  %1397 = vst [vmem:[#allocation11] sm:$0xff] %v1387_v56  ;;  %1398 = vst [vmem:[#allocation11 + $0x8] sm:$0xff] %v1388_v0 }
 0x3e1   :  { %1399 = vst [vmem:[#allocation11 + $0x10] sm:$0xff] %v1389_v63  ;;  %1400 = vst [vmem:[#allocation11 + $0x18] sm:$0xff] %v1390_v47 }
 0x3e2   :  { %1401 = vst [vmem:[#allocation11 + $0x20] sm:$0xff] %v1391_v55  ;;  %1402 = vst [vmem:[#allocation11 + $0x28] sm:$0xff] %v1392_v40 }
 0x3e3   :  { %1403 = vst [vmem:[#allocation11 + $0x30] sm:$0xff] %v1393_v31  ;;  %1404 = vst [vmem:[#allocation11 + $0x38] sm:$0xff] %v1394_v8 }
 0x3e4   :  { %1405 = vst [vmem:[#allocation11 + $0x40] sm:$0xff] %v1395_v13  ;;  %1406 = vst [vmem:[#allocation11 + $0x48] sm:$0xff] %v1396_v34 }
 0x3e5   :  { %1577 = shalt.err (!%p1574_p6)
}
 0x3e6   :  { %s1578_s15 = scalar_lea.hbm %s2327_s3, 1280 }
 0x3e7   :  { %p1579_p7 = scmp.ne.s32.totalorder %s2327_s3, %s1578_s15  ;;  %p1582_p8 = scmp.lt.u32.totalorder %s1578_s15, %s2327_s3 }
 0x3e9   :  { %p1584_p9 = pnand %p1582_p8, %p1579_p7 }
 0x3eb   :  { %1587 = shalt.err (!%p1584_p9)
}
 0x3ec   :  { %1416 = dma.vmem_to_hbm [thread:$0]  %s1414_s11, 1280, %s2327_s3, [#allocation8]  }
 0x3ed   :  { %1592 = dma.done.wait [#allocation8], 1280  }
 0x3ee   :  { %1593 = vsyncadd [#allocation8], 4294966016 }
 0x3ef   :  { %1420 = vsyncpa [#allocation7], 1 }
 0x3f0   :  { %1421 = vsyncpa [#allocation10], 1 }
 0x3f1   :  { %1422 = vsyncpa [#allocation8], 1 }

</bundles_post_ra>
